<compile_context>
chip_gen: v5e
topology: v5e:2x2
jax: 0.10.0
libtpu: 0.0.40
codegen_flags: <defaults>
</compile_context>

<pallas_src>
import functools
import math

import jax
import jax.numpy as jnp
from jax import lax
from jax.experimental import pallas as pl
from jax.experimental.pallas import tpu as pltpu


# ------------------------- stage 1: conv1 (VPU) ----------------------------- #

def _conv1_vpu_kernel(p_ref, w_ref, b_ref, o_ref):
    """Conv2d(1, odim, 3, 2) + bias + ReLU as 9 VPU broadcast multiply-adds.

    p_ref: (1, TM, 9)  f32  im2col rows (row = t1*F1 + f1, tap = kh*3 + kw)
    w_ref: (9, Co)     f32
    b_ref: (1, Co)     f32
    o_ref: (1, TM, Co) f32
    """
    p = p_ref[0]                       # (TM, 9)
    w = w_ref[...]                     # (9, Co)
    tm = p.shape[0]
    co = w.shape[1]
    acc = jnp.zeros((tm, co), jnp.float32)
    for k in range(9):                 # Cin == 1, so 9 scalar weights per channel
        acc = acc + p[:, k:k + 1] * w[k:k + 1, :]
    acc = acc + b_ref[...]
    o_ref[0] = jnp.maximum(acc, 0.0)


def conv1_relu(p1, w1m, b1, *, tm):
    B, M1, _ = p1.shape
    Co = w1m.shape[1]
    return pl.pallas_call(
        _conv1_vpu_kernel,
        out_shape=jax.ShapeDtypeStruct((B, M1, Co), jnp.float32),
        grid=(B, pl.cdiv(M1, tm)),
        in_specs=[
            pl.BlockSpec((1, tm, 9), lambda b, m: (b, m, 0)),
            pl.BlockSpec((9, Co), lambda b, m: (0, 0)),
            pl.BlockSpec((1, Co), lambda b, m: (0, 0)),
        ],
        out_specs=pl.BlockSpec((1, tm, Co), lambda b, m: (b, m, 0)),
        compiler_params=pltpu.CompilerParams(
            dimension_semantics=("parallel", "parallel")),
    )(p1, w1m, b1)


# ----- stage 2: fused conv2 + ReLU + flatten + Linear + posenc (MXU) --------- #

def _conv2_linear_posenc_kernel(y1_ref, yh_ref, pe_ref, w2_ref, wp_ref,
                                b2_ref, bo_ref, o_ref, *, tt2, f2n, xscale):
    """Per (batch, time-tile) block:
       conv2 (3x3, stride 2) as 9 shift-and-accumulate bf16 matmuls + bias + ReLU,
       then the (c,f)-flattened Linear (weight pre-permuted) + bias,
       then * sqrt(odim) + positional encoding.

    y1_ref: (1, 2*tt2, F1, Ci) f32   conv1 output tile (time rows 2*j*tt2 ...)
    yh_ref: (1, 1, F1, Ci)     f32   halo: time row 2*tt2 relative to the tile
    pe_ref: (tt2, odim)        f32
    w2_ref: (9, Ci, Co)        bf16  tap-major conv2 weights
    wp_ref: (f2n, Co, odim)    bf16  permuted Linear weight (folds the transpose)
    b2_ref: (1, Co) f32 ; bo_ref: (1, odim) f32
    o_ref : (1, tt2, odim)
    """
    two_tt = 2 * tt2
    co = w2_ref.shape[2]
    odim = wp_ref.shape[2]

    def y1_row(r, f1):
        # (1, Ci) row at in-tile time index r, freq index f1 (static indices).
        if r < two_tt:
            return y1_ref[0, r, f1:f1 + 1, :]
        return yh_ref[0, 0, f1:f1 + 1, :]

    # ---- conv2: 9 accumulated matmuls over the whole tile (M = f2n*tt2) ----
    # activation rows are ordered f2-major / tt-minor: row = f2*tt2 + tt
    acc2 = jnp.zeros((f2n * tt2, co), jnp.float32)
    for kh in range(3):
        for kw in range(3):
            rows = [y1_row(2 * tt + kh, 2 * f + kw)
                    for f in range(f2n) for tt in range(tt2)]
            a = jnp.concatenate(rows, axis=0).astype(jnp.bfloat16)   # (f2n*tt2, Ci)
            acc2 = acc2 + jnp.dot(a, w2_ref[kh * 3 + kw],
                                  preferred_element_type=jnp.float32)
    y2 = jnp.maximum(acc2 + b2_ref[...], 0.0)                        # (f2n*tt2, Co)

    # ---- Linear(odim*F2 -> odim): out[tt,n] = sum_{f,c} y2[f*tt2+tt,c]*wp[f,c,n]
    acc = jnp.zeros((tt2, odim), jnp.float32)
    for f in range(f2n):
        blk = y2[f * tt2:(f + 1) * tt2, :].astype(jnp.bfloat16)      # (tt2, Co)
        acc = acc + jnp.dot(blk, wp_ref[f], preferred_element_type=jnp.float32)

    out = (acc + bo_ref[...]) * xscale + pe_ref[...]
    o_ref[0] = out.astype(o_ref.dtype)


def conv2_linear_posenc(y1, pe_slice, w2m, wp, b2, bo, *, tt2, xscale):
    B, T1, F1, Ci = y1.shape
    Co = w2m.shape[2]
    F2 = wp.shape[0]
    odim = wp.shape[2]
    T2 = pe_slice.shape[0]
    n_j = pl.cdiv(T2, tt2)

    kern = functools.partial(_conv2_linear_posenc_kernel,
                             tt2=tt2, f2n=F2, xscale=xscale)

    y1_spec = pl.BlockSpec((1, 2 * tt2, F1, Ci), lambda b, j: (b, j, 0, 0))
    # halo = single y1 time row 2*tt2*(j+1) (block size 1 -> block idx == element idx)
    halo_spec = pl.BlockSpec(
        (1, 1, F1, Ci),
        lambda b, j: (b, jnp.minimum(2 * tt2 * (j + 1), T1 - 1), 0, 0))
    pe_spec = pl.BlockSpec((tt2, odim), lambda b, j: (j, 0))   # shared across batch
    w2_spec = pl.BlockSpec((9, Ci, Co), lambda b, j: (0, 0, 0))
    wp_spec = pl.BlockSpec((F2, Co, odim), lambda b, j: (0, 0, 0))
    b2_spec = pl.BlockSpec((1, Co), lambda b, j: (0, 0))
    bo_spec = pl.BlockSpec((1, odim), lambda b, j: (0, 0))

    return pl.pallas_call(
        kern,
        out_shape=jax.ShapeDtypeStruct((B, T2, odim), jnp.float32),
        grid=(B, n_j),
        in_specs=[y1_spec, halo_spec, pe_spec, w2_spec, wp_spec, b2_spec, bo_spec],
        out_specs=pl.BlockSpec((1, tt2, odim), lambda b, j: (b, j, 0)),
        compiler_params=pltpu.CompilerParams(
            dimension_semantics=("parallel", "parallel")),
    )(y1, y1, pe_slice, w2m, wp, b2, bo)


# --------------------------------- glue ------------------------------------ #

def _im2col_taps_3x3_s2(x):
    """x: (B, H, W) Cin=1 -> (B, Ho*Wo, 9) patches for a 3x3 / stride-2 VALID conv.
    Tap order is (kh, kw); row order is (t1-major, f1-minor).  Cheap XLA glue:
    the patch tensor is ~2.25x the (tiny, Cin=1) input."""
    B, H, W = x.shape
    Ho = (H - 3) // 2 + 1
    Wo = (W - 3) // 2 + 1
    cols = []
    for i in range(3):
        for j in range(3):
            cols.append(x[:, i:i + 2 * (Ho - 1) + 1:2, j:j + 2 * (Wo - 1) + 1:2])
    p = jnp.stack(cols, axis=-1)                     # (B, Ho, Wo, 9)
    return p.reshape(B, Ho * Wo, 9), Ho, Wo


def sinusoidal_pe(max_len, d_model):
    position = jnp.arange(max_len, dtype=jnp.float32)[:, None]
    div_term = jnp.exp(
        jnp.arange(0, d_model, 2, dtype=jnp.float32) * -(math.log(10000.0) / d_model))
    pe = jnp.zeros((max_len, d_model), dtype=jnp.float32)
    pe = pe.at[:, 0::2].set(jnp.sin(position * div_term))
    pe = pe.at[:, 1::2].set(jnp.cos(position * div_term))
    return pe[None]                                  # (1, max_len, d_model)


def init_params(key, idim, odim, max_len=5000):
    k1, k2, k3, k4, k5, k6 = jax.random.split(key, 6)
    f_out = ((idim - 1) // 2 - 1) // 2
    return {
        "w1": 0.1 * jax.random.normal(k1, (odim, 1, 3, 3), jnp.float32),
        "b1": 0.1 * jax.random.normal(k2, (odim,), jnp.float32),
        "w2": 0.1 * jax.random.normal(k3, (odim, odim, 3, 3), jnp.float32),
        "b2": 0.1 * jax.random.normal(k4, (odim,), jnp.float32),
        "w_out": 0.1 * jax.random.normal(k5, (odim, odim * f_out), jnp.float32),
        "b_out": 0.1 * jax.random.normal(k6, (odim,), jnp.float32),
        "pe": sinusoidal_pe(max_len, odim),
    }


def prepare_params(params):
    """One-time weight reshapes/permutations (kept out of the per-step forward)."""
    odim = params["w1"].shape[0]
    F2 = params["w_out"].shape[1] // odim
    # conv1 weights: (Co,1,3,3) -> (9, Co), tap = kh*3 + kw
    w1m = jnp.transpose(params["w1"], (2, 3, 1, 0)).reshape(9, odim)
    # conv2 weights: (Co,Ci,3,3) -> (9, Ci, Co), tap = kh*3 + kw
    w2m = jnp.transpose(params["w2"], (2, 3, 1, 0)).reshape(9, odim, odim)
    # Linear weight W[n, c*F2 + f] -> wp[f, c, n]  (folds the PyTorch transpose/view)
    wp = jnp.transpose(params["w_out"].reshape(odim, odim, F2), (2, 1, 0))
    return {
        "w1m": w1m.astype(jnp.float32),
        "b1": params["b1"].reshape(1, odim).astype(jnp.float32),
        "w2m": w2m.astype(jnp.bfloat16),
        "b2": params["b2"].reshape(1, odim).astype(jnp.float32),
        "wp": wp.astype(jnp.bfloat16),
        "bo": params["b_out"].reshape(1, odim).astype(jnp.float32),
        "pe": params["pe"].astype(jnp.float32),
    }


def conv2d_subsampling4_forward(x, x_mask, prep, offset=0):
    """x: (B, T, idim) f32, x_mask: (B, 1, T) bool -> (out (B,T2,odim), pos_emb, mask')."""
    B, T, idim = x.shape
    odim = prep["w1m"].shape[1]

    # ---- conv1 (Conv2d(1, odim, 3, 2)) + ReLU ----
    p1, T1, F1 = _im2col_taps_3x3_s2(x)              # (B, T1*F1, 9)
    M1 = T1 * F1
    tm1 = M1 if M1 <= 1024 else 1024                 # 1024-row tiles for real shapes
    y1 = conv1_relu(p1, prep["w1m"], prep["b1"], tm=tm1)   # (B, M1, odim) f32
    y1 = y1.reshape(B, T1, F1, odim)

    # ---- fused conv2 + ReLU + (b,t,c*f) flatten + Linear + xscale + posenc ----
    T2 = (T1 - 3) // 2 + 1
    tt2 = T2 if T2 <= 8 else 8                       # time tile of the output
    pe_slice = prep["pe"][0, offset:offset + T2, :]  # (T2, odim), shared over batch
    xscale = math.sqrt(odim)
    out = conv2_linear_posenc(y1, pe_slice, prep["w2m"], prep["wp"],
                              prep["b2"], prep["bo"], tt2=tt2, xscale=xscale)

    pos_emb = prep["pe"][:, offset:offset + T2, :]   # dropout = identity (eval)
    new_mask = x_mask[:, :, :-2:2][:, :, :-2:2]
    return out, pos_emb, new_mask


# --------------------------- pure-JAX reference ----------------------------- #

def reference_forward(x, x_mask, params, offset=0):
    odim = params["w1"].shape[0]
    xc = x[:, None, :, :]                            # NCHW
    y1 = lax.conv_general_dilated(
        xc, params["w1"], (2, 2), "VALID",
        dimension_numbers=("NCHW", "OIHW", "NCHW"),
        precision=lax.Precision.HIGHEST)
    y1 = jax.nn.relu(y1 + params["b1"][None, :, None, None])
    y2 = lax.conv_general_dilated(
        y1, params["w2"], (2, 2), "VALID",
        dimension_numbers=("NCHW", "OIHW", "NCHW"),
        precision=lax.Precision.HIGHEST)
    y2 = jax.nn.relu(y2 + params["b2"][None, :, None, None])
    b, c, t, f = y2.shape
    feat = jnp.transpose(y2, (0, 2, 1, 3)).reshape(b, t, c * f)
    lin = jnp.dot(feat, params["w_out"].T,
                  precision=lax.Precision.HIGHEST) + params["b_out"]
    pe = params["pe"][:, offset:offset + t, :]
    out = lin * math.sqrt(odim) + pe
    return out, pe, x_mask[:, :, :-2:2][:, :, :-2:2]


# ---------------------------------- main ------------------------------------ #

if __name__ == "__main__":
    B, T, idim, odim = 2, 16, 16, 32

    key = jax.random.PRNGKey(0)
    kx, kp = jax.random.split(key)
    x = jax.random.normal(kx, (B, T, idim), jnp.float32)
    x_mask = jnp.ones((B, 1, T), dtype=bool)
    params = init_params(kp, idim, odim)
    prep = prepare_params(params)

    fwd = jax.jit(functools.partial(conv2d_subsampling4_forward, offset=0))
    out, pos_emb, new_mask = fwd(x, x_mask, prep)
    jax.block_until_ready(out)
    jax.block_until_ready(pos_emb)
    jax.block_until_ready(new_mask)

    # validate against pure-JAX reference (Pallas path uses bf16 MXU matmuls with
    # f32 accumulation, so the tolerance is bf16-level).
    ref_out, ref_pe, ref_mask = reference_forward(x, x_mask, params, offset=0)
    assert out.shape == (B, T // 4 - 1, odim), out.shape          # (2, 3, 32)
    assert new_mask.shape == ref_mask.shape
    assert jnp.allclose(out, ref_out, atol=5e-2, rtol=5e-2), \
        float(jnp.max(jnp.abs(out - ref_out)))
    assert jnp.allclose(pos_emb, ref_pe)
    assert bool(jnp.all(new_mask == ref_mask))

    print("KERNEL_OK")
</pallas_src>

<mosaic_0001>
module attributes {stable_mosaic.version = 11 : i64} {
  func.func @_conv1_vpu_kernel(%arg0: i32, %arg1: i32, %arg2: memref<1x49x9xf32, #tpu.memory_space<vmem>>, %arg3: memref<9x32xf32, #tpu.memory_space<vmem>>, %arg4: memref<1x32xf32, #tpu.memory_space<vmem>>, %arg5: memref<1x49x32xf32, #tpu.memory_space<vmem>>) attributes {dimension_semantics = [#tpu.dimension_semantics<parallel>, #tpu.dimension_semantics<parallel>], iteration_bounds = array<i64: 2, 1>, scalar_prefetch = 0 : i64, scratch_operands = 0 : i64, tpu.core_type = #tpu.core_type<tc>, window_params = [{transform_indices = @transform_0, window_bounds = array<i64: 1, 49, 9>}, {pipeline_mode = #tpu.pipeline_mode<synchronous>, transform_indices = @transform_1, window_bounds = array<i64: 9, 32>}, {pipeline_mode = #tpu.pipeline_mode<synchronous>, transform_indices = @transform_2, window_bounds = array<i64: 1, 32>}, {transform_indices = @transform_3, window_bounds = array<i64: 1, 49, 32>}]} {
    %c0 = arith.constant 0 : index
    %c0_0 = arith.constant 0 : index
    %c0_1 = arith.constant 0 : index
    %0 = vector.load %arg2[%c0, %c0_0, %c0_1] : memref<1x49x9xf32, #tpu.memory_space<vmem>>, vector<1x49x9xf32>
    %1 = vector.shape_cast %0 : vector<1x49x9xf32> to vector<49x9xf32>
    %c0_2 = arith.constant 0 : index
    %c0_3 = arith.constant 0 : index
    %2 = vector.load %arg3[%c0_2, %c0_3] : memref<9x32xf32, #tpu.memory_space<vmem>>, vector<9x32xf32>
    %cst = arith.constant 0.000000e+00 : f32
    %3 = vector.broadcast %cst : f32 to vector<49x32xf32>
    %4 = vector.extract_strided_slice %1 {offsets = [0, 0], sizes = [49, 1], strides = [1, 1]} : vector<49x9xf32> to vector<49x1xf32>
    %5 = vector.extract_strided_slice %2 {offsets = [0, 0], sizes = [1, 32], strides = [1, 1]} : vector<9x32xf32> to vector<1x32xf32>
    %6 = vector.broadcast %4 : vector<49x1xf32> to vector<49x32xf32>
    %7 = vector.broadcast %5 : vector<1x32xf32> to vector<49x32xf32>
    %8 = arith.mulf %6, %7 : vector<49x32xf32>
    %9 = arith.addf %3, %8 : vector<49x32xf32>
    %10 = vector.extract_strided_slice %1 {offsets = [0, 1], sizes = [49, 1], strides = [1, 1]} : vector<49x9xf32> to vector<49x1xf32>
    %11 = vector.extract_strided_slice %2 {offsets = [1, 0], sizes = [1, 32], strides = [1, 1]} : vector<9x32xf32> to vector<1x32xf32>
    %12 = vector.broadcast %10 : vector<49x1xf32> to vector<49x32xf32>
    %13 = vector.broadcast %11 : vector<1x32xf32> to vector<49x32xf32>
    %14 = arith.mulf %12, %13 : vector<49x32xf32>
    %15 = arith.addf %9, %14 : vector<49x32xf32>
    %16 = vector.extract_strided_slice %1 {offsets = [0, 2], sizes = [49, 1], strides = [1, 1]} : vector<49x9xf32> to vector<49x1xf32>
    %17 = vector.extract_strided_slice %2 {offsets = [2, 0], sizes = [1, 32], strides = [1, 1]} : vector<9x32xf32> to vector<1x32xf32>
    %18 = vector.broadcast %16 : vector<49x1xf32> to vector<49x32xf32>
    %19 = vector.broadcast %17 : vector<1x32xf32> to vector<49x32xf32>
    %20 = arith.mulf %18, %19 : vector<49x32xf32>
    %21 = arith.addf %15, %20 : vector<49x32xf32>
    %22 = vector.extract_strided_slice %1 {offsets = [0, 3], sizes = [49, 1], strides = [1, 1]} : vector<49x9xf32> to vector<49x1xf32>
    %23 = vector.extract_strided_slice %2 {offsets = [3, 0], sizes = [1, 32], strides = [1, 1]} : vector<9x32xf32> to vector<1x32xf32>
    %24 = vector.broadcast %22 : vector<49x1xf32> to vector<49x32xf32>
    %25 = vector.broadcast %23 : vector<1x32xf32> to vector<49x32xf32>
    %26 = arith.mulf %24, %25 : vector<49x32xf32>
    %27 = arith.addf %21, %26 : vector<49x32xf32>
    %28 = vector.extract_strided_slice %1 {offsets = [0, 4], sizes = [49, 1], strides = [1, 1]} : vector<49x9xf32> to vector<49x1xf32>
    %29 = vector.extract_strided_slice %2 {offsets = [4, 0], sizes = [1, 32], strides = [1, 1]} : vector<9x32xf32> to vector<1x32xf32>
    %30 = vector.broadcast %28 : vector<49x1xf32> to vector<49x32xf32>
    %31 = vector.broadcast %29 : vector<1x32xf32> to vector<49x32xf32>
    %32 = arith.mulf %30, %31 : vector<49x32xf32>
    %33 = arith.addf %27, %32 : vector<49x32xf32>
    %34 = vector.extract_strided_slice %1 {offsets = [0, 5], sizes = [49, 1], strides = [1, 1]} : vector<49x9xf32> to vector<49x1xf32>
    %35 = vector.extract_strided_slice %2 {offsets = [5, 0], sizes = [1, 32], strides = [1, 1]} : vector<9x32xf32> to vector<1x32xf32>
    %36 = vector.broadcast %34 : vector<49x1xf32> to vector<49x32xf32>
    %37 = vector.broadcast %35 : vector<1x32xf32> to vector<49x32xf32>
    %38 = arith.mulf %36, %37 : vector<49x32xf32>
    %39 = arith.addf %33, %38 : vector<49x32xf32>
    %40 = vector.extract_strided_slice %1 {offsets = [0, 6], sizes = [49, 1], strides = [1, 1]} : vector<49x9xf32> to vector<49x1xf32>
    %41 = vector.extract_strided_slice %2 {offsets = [6, 0], sizes = [1, 32], strides = [1, 1]} : vector<9x32xf32> to vector<1x32xf32>
    %42 = vector.broadcast %40 : vector<49x1xf32> to vector<49x32xf32>
    %43 = vector.broadcast %41 : vector<1x32xf32> to vector<49x32xf32>
    %44 = arith.mulf %42, %43 : vector<49x32xf32>
    %45 = arith.addf %39, %44 : vector<49x32xf32>
    %46 = vector.extract_strided_slice %1 {offsets = [0, 7], sizes = [49, 1], strides = [1, 1]} : vector<49x9xf32> to vector<49x1xf32>
    %47 = vector.extract_strided_slice %2 {offsets = [7, 0], sizes = [1, 32], strides = [1, 1]} : vector<9x32xf32> to vector<1x32xf32>
    %48 = vector.broadcast %46 : vector<49x1xf32> to vector<49x32xf32>
    %49 = vector.broadcast %47 : vector<1x32xf32> to vector<49x32xf32>
    %50 = arith.mulf %48, %49 : vector<49x32xf32>
    %51 = arith.addf %45, %50 : vector<49x32xf32>
    %52 = vector.extract_strided_slice %1 {offsets = [0, 8], sizes = [49, 1], strides = [1, 1]} : vector<49x9xf32> to vector<49x1xf32>
    %53 = vector.extract_strided_slice %2 {offsets = [8, 0], sizes = [1, 32], strides = [1, 1]} : vector<9x32xf32> to vector<1x32xf32>
    %54 = vector.broadcast %52 : vector<49x1xf32> to vector<49x32xf32>
    %55 = vector.broadcast %53 : vector<1x32xf32> to vector<49x32xf32>
    %56 = arith.mulf %54, %55 : vector<49x32xf32>
    %57 = arith.addf %51, %56 : vector<49x32xf32>
    %c0_4 = arith.constant 0 : index
    %c0_5 = arith.constant 0 : index
    %58 = vector.load %arg4[%c0_4, %c0_5] : memref<1x32xf32, #tpu.memory_space<vmem>>, vector<1x32xf32>
    %59 = vector.broadcast %58 : vector<1x32xf32> to vector<49x32xf32>
    %60 = arith.addf %57, %59 : vector<49x32xf32>
    %cst_6 = arith.constant 0.000000e+00 : f32
    %61 = vector.broadcast %cst_6 : f32 to vector<49x32xf32>
    %62 = arith.maximumf %60, %61 : vector<49x32xf32>
    %c0_7 = arith.constant 0 : index
    %c0_8 = arith.constant 0 : index
    %c0_9 = arith.constant 0 : index
    %63 = vector.load %arg5[%c0_7, %c0_8, %c0_9] : memref<1x49x32xf32, #tpu.memory_space<vmem>>, vector<1x49x32xf32>
    %64 = vector.shape_cast %63 : vector<1x49x32xf32> to vector<49x32xf32>
    %65 = vector.shape_cast %62 : vector<49x32xf32> to vector<1x49x32xf32>
    tpu.vector_store %arg5[%c0_7, %c0_8, %c0_9], %65 {strides = array<i32>} : memref<1x49x32xf32, #tpu.memory_space<vmem>>, vector<1x49x32xf32>,
    return
  }
  func.func @transform_0(%arg0: i32, %arg1: i32) -> (i32, i32, i32) {
    %c0_i32 = arith.constant 0 : i32
    %c0_i32_0 = arith.constant 0 : i32
    return %arg0, %arg1, %c0_i32 : i32, i32, i32
  }
  func.func @transform_1(%arg0: i32, %arg1: i32) -> (i32, i32) {
    %c0_i32 = arith.constant 0 : i32
    %c0_i32_0 = arith.constant 0 : i32
    %c0_i32_1 = arith.constant 0 : i32
    return %c0_i32, %c0_i32_0 : i32, i32
  }
  func.func @transform_2(%arg0: i32, %arg1: i32) -> (i32, i32) {
    %c0_i32 = arith.constant 0 : i32
    %c0_i32_0 = arith.constant 0 : i32
    %c0_i32_1 = arith.constant 0 : i32
    return %c0_i32, %c0_i32_0 : i32, i32
  }
  func.func @transform_3(%arg0: i32, %arg1: i32) -> (i32, i32, i32) {
    %c0_i32 = arith.constant 0 : i32
    %c0_i32_0 = arith.constant 0 : i32
    return %arg0, %arg1, %c0_i32 : i32, i32, i32
  }
}

module attributes {stable_mosaic.version = 11 : i64} {
  func.func @_conv2_linear_posenc_kernel(%arg0: i32, %arg1: i32, %arg2: memref<1x6x7x32xf32, #tpu.memory_space<vmem>>, %arg3: memref<1x1x7x32xf32, #tpu.memory_space<vmem>>, %arg4: memref<3x32xf32, #tpu.memory_space<vmem>>, %arg5: memref<9x32x32xbf16, #tpu.memory_space<vmem>>, %arg6: memref<3x32x32xbf16, #tpu.memory_space<vmem>>, %arg7: memref<1x32xf32, #tpu.memory_space<vmem>>, %arg8: memref<1x32xf32, #tpu.memory_space<vmem>>, %arg9: memref<1x3x32xf32, #tpu.memory_space<vmem>>) attributes {dimension_semantics = [#tpu.dimension_semantics<parallel>, #tpu.dimension_semantics<parallel>], iteration_bounds = array<i64: 2, 1>, scalar_prefetch = 0 : i64, scratch_operands = 0 : i64, tpu.core_type = #tpu.core_type<tc>, window_params = [{transform_indices = @transform_0, window_bounds = array<i64: 1, 6, 7, 32>}, {transform_indices = @transform_1, window_bounds = array<i64: 1, 1, 7, 32>}, {transform_indices = @transform_2, window_bounds = array<i64: 3, 32>}, {pipeline_mode = #tpu.pipeline_mode<synchronous>, transform_indices = @transform_3, window_bounds = array<i64: 9, 32, 32>}, {pipeline_mode = #tpu.pipeline_mode<synchronous>, transform_indices = @transform_4, window_bounds = array<i64: 3, 32, 32>}, {pipeline_mode = #tpu.pipeline_mode<synchronous>, transform_indices = @transform_5, window_bounds = array<i64: 1, 32>}, {pipeline_mode = #tpu.pipeline_mode<synchronous>, transform_indices = @transform_6, window_bounds = array<i64: 1, 32>}, {transform_indices = @transform_7, window_bounds = array<i64: 1, 3, 32>}]} {
    %cst = arith.constant 0.000000e+00 : f32
    %0 = vector.broadcast %cst : f32 to vector<9x32xf32>
    %c0 = arith.constant 0 : index
    %c0_0 = arith.constant 0 : index
    %c0_1 = arith.constant 0 : index
    %c0_2 = arith.constant 0 : index
    %1 = vector.load %arg2[%c0, %c0_0, %c0_1, %c0_2] : memref<1x6x7x32xf32, #tpu.memory_space<vmem>>, vector<1x1x1x32xf32>
    %2 = vector.shape_cast %1 : vector<1x1x1x32xf32> to vector<1x32xf32>
    %c0_3 = arith.constant 0 : index
    %c2 = arith.constant 2 : index
    %c0_4 = arith.constant 0 : index
    %c0_5 = arith.constant 0 : index
    %3 = vector.load %arg2[%c0_3, %c2, %c0_4, %c0_5] : memref<1x6x7x32xf32, #tpu.memory_space<vmem>>, vector<1x1x1x32xf32>
    %4 = vector.shape_cast %3 : vector<1x1x1x32xf32> to vector<1x32xf32>
    %c0_6 = arith.constant 0 : index
    %c4 = arith.constant 4 : index
    %c0_7 = arith.constant 0 : index
    %c0_8 = arith.constant 0 : index
    %5 = vector.load %arg2[%c0_6, %c4, %c0_7, %c0_8] : memref<1x6x7x32xf32, #tpu.memory_space<vmem>>, vector<1x1x1x32xf32>
    %6 = vector.shape_cast %5 : vector<1x1x1x32xf32> to vector<1x32xf32>
    %c0_9 = arith.constant 0 : index
    %c0_10 = arith.constant 0 : index
    %c2_11 = arith.constant 2 : index
    %c0_12 = arith.constant 0 : index
    %7 = vector.load %arg2[%c0_9, %c0_10, %c2_11, %c0_12] : memref<1x6x7x32xf32, #tpu.memory_space<vmem>>, vector<1x1x1x32xf32>
    %8 = vector.shape_cast %7 : vector<1x1x1x32xf32> to vector<1x32xf32>
    %c0_13 = arith.constant 0 : index
    %c2_14 = arith.constant 2 : index
    %c2_15 = arith.constant 2 : index
    %c0_16 = arith.constant 0 : index
    %9 = vector.load %arg2[%c0_13, %c2_14, %c2_15, %c0_16] : memref<1x6x7x32xf32, #tpu.memory_space<vmem>>, vector<1x1x1x32xf32>
    %10 = vector.shape_cast %9 : vector<1x1x1x32xf32> to vector<1x32xf32>
    %c0_17 = arith.constant 0 : index
    %c4_18 = arith.constant 4 : index
    %c2_19 = arith.constant 2 : index
    %c0_20 = arith.constant 0 : index
    %11 = vector.load %arg2[%c0_17, %c4_18, %c2_19, %c0_20] : memref<1x6x7x32xf32, #tpu.memory_space<vmem>>, vector<1x1x1x32xf32>
    %12 = vector.shape_cast %11 : vector<1x1x1x32xf32> to vector<1x32xf32>
    %c0_21 = arith.constant 0 : index
    %c0_22 = arith.constant 0 : index
    %c4_23 = arith.constant 4 : index
    %c0_24 = arith.constant 0 : index
    %13 = vector.load %arg2[%c0_21, %c0_22, %c4_23, %c0_24] : memref<1x6x7x32xf32, #tpu.memory_space<vmem>>, vector<1x1x1x32xf32>
    %14 = vector.shape_cast %13 : vector<1x1x1x32xf32> to vector<1x32xf32>
    %c0_25 = arith.constant 0 : index
    %c2_26 = arith.constant 2 : index
    %c4_27 = arith.constant 4 : index
    %c0_28 = arith.constant 0 : index
    %15 = vector.load %arg2[%c0_25, %c2_26, %c4_27, %c0_28] : memref<1x6x7x32xf32, #tpu.memory_space<vmem>>, vector<1x1x1x32xf32>
    %16 = vector.shape_cast %15 : vector<1x1x1x32xf32> to vector<1x32xf32>
    %c0_29 = arith.constant 0 : index
    %c4_30 = arith.constant 4 : index
    %c4_31 = arith.constant 4 : index
    %c0_32 = arith.constant 0 : index
    %17 = vector.load %arg2[%c0_29, %c4_30, %c4_31, %c0_32] : memref<1x6x7x32xf32, #tpu.memory_space<vmem>>, vector<1x1x1x32xf32>
    %18 = vector.shape_cast %17 : vector<1x1x1x32xf32> to vector<1x32xf32>
    %19 = tpu.concatenate %2, %4, %6, %8, %10, %12, %14, %16, %18 in 0 : vector<1x32xf32>, vector<1x32xf32>, vector<1x32xf32>, vector<1x32xf32>, vector<1x32xf32>, vector<1x32xf32>, vector<1x32xf32>, vector<1x32xf32>, vector<1x32xf32> -> vector<9x32xf32>
    %20 = arith.truncf %19 : vector<9x32xf32> to vector<9x32xbf16>
    %c0_33 = arith.constant 0 : index
    %c0_34 = arith.constant 0 : index
    %c0_35 = arith.constant 0 : index
    %21 = vector.load %arg5[%c0_33, %c0_34, %c0_35] : memref<9x32x32xbf16, #tpu.memory_space<vmem>>, vector<1x32x32xbf16>
    %22 = vector.shape_cast %21 : vector<1x32x32xbf16> to vector<32x32xbf16>
    %cst_36 = arith.constant dense<0.000000e+00> : vector<9x32xf32>
    %23 = tpu.matmul %20, %22, %cst_36 {dimension_numbers = #tpu.dot_dimension_numbers<[1], [0], [0], [1], [0, 0, 1, 1], [], []>} : vector<9x32xbf16>, vector<32x32xbf16>, vector<9x32xf32> -> vector<9x32xf32>
    %24 = arith.addf %0, %23 : vector<9x32xf32>
    %c0_37 = arith.constant 0 : index
    %c0_38 = arith.constant 0 : index
    %c1 = arith.constant 1 : index
    %c0_39 = arith.constant 0 : index
    %25 = vector.load %arg2[%c0_37, %c0_38, %c1, %c0_39] : memref<1x6x7x32xf32, #tpu.memory_space<vmem>>, vector<1x1x1x32xf32>
    %26 = vector.shape_cast %25 : vector<1x1x1x32xf32> to vector<1x32xf32>
    %c0_40 = arith.constant 0 : index
    %c2_41 = arith.constant 2 : index
    %c1_42 = arith.constant 1 : index
    %c0_43 = arith.constant 0 : index
    %27 = vector.load %arg2[%c0_40, %c2_41, %c1_42, %c0_43] : memref<1x6x7x32xf32, #tpu.memory_space<vmem>>, vector<1x1x1x32xf32>
    %28 = vector.shape_cast %27 : vector<1x1x1x32xf32> to vector<1x32xf32>
    %c0_44 = arith.constant 0 : index
    %c4_45 = arith.constant 4 : index
    %c1_46 = arith.constant 1 : index
    %c0_47 = arith.constant 0 : index
    %29 = vector.load %arg2[%c0_44, %c4_45, %c1_46, %c0_47] : memref<1x6x7x32xf32, #tpu.memory_space<vmem>>, vector<1x1x1x32xf32>
    %30 = vector.shape_cast %29 : vector<1x1x1x32xf32> to vector<1x32xf32>
    %c0_48 = arith.constant 0 : index
    %c0_49 = arith.constant 0 : index
    %c3 = arith.constant 3 : index
    %c0_50 = arith.constant 0 : index
    %31 = vector.load %arg2[%c0_48, %c0_49, %c3, %c0_50] : memref<1x6x7x32xf32, #tpu.memory_space<vmem>>, vector<1x1x1x32xf32>
    %32 = vector.shape_cast %31 : vector<1x1x1x32xf32> to vector<1x32xf32>
    %c0_51 = arith.constant 0 : index
    %c2_52 = arith.constant 2 : index
    %c3_53 = arith.constant 3 : index
    %c0_54 = arith.constant 0 : index
    %33 = vector.load %arg2[%c0_51, %c2_52, %c3_53, %c0_54] : memref<1x6x7x32xf32, #tpu.memory_space<vmem>>, vector<1x1x1x32xf32>
    %34 = vector.shape_cast %33 : vector<1x1x1x32xf32> to vector<1x32xf32>
    %c0_55 = arith.constant 0 : index
    %c4_56 = arith.constant 4 : index
    %c3_57 = arith.constant 3 : index
    %c0_58 = arith.constant 0 : index
    %35 = vector.load %arg2[%c0_55, %c4_56, %c3_57, %c0_58] : memref<1x6x7x32xf32, #tpu.memory_space<vmem>>, vector<1x1x1x32xf32>
    %36 = vector.shape_cast %35 : vector<1x1x1x32xf32> to vector<1x32xf32>
    %c0_59 = arith.constant 0 : index
    %c0_60 = arith.constant 0 : index
    %c5 = arith.constant 5 : index
    %c0_61 = arith.constant 0 : index
    %37 = vector.load %arg2[%c0_59, %c0_60, %c5, %c0_61] : memref<1x6x7x32xf32, #tpu.memory_space<vmem>>, vector<1x1x1x32xf32>
    %38 = vector.shape_cast %37 : vector<1x1x1x32xf32> to vector<1x32xf32>
    %c0_62 = arith.constant 0 : index
    %c2_63 = arith.constant 2 : index
    %c5_64 = arith.constant 5 : index
    %c0_65 = arith.constant 0 : index
    %39 = vector.load %arg2[%c0_62, %c2_63, %c5_64, %c0_65] : memref<1x6x7x32xf32, #tpu.memory_space<vmem>>, vector<1x1x1x32xf32>
    %40 = vector.shape_cast %39 : vector<1x1x1x32xf32> to vector<1x32xf32>
    %c0_66 = arith.constant 0 : index
    %c4_67 = arith.constant 4 : index
    %c5_68 = arith.constant 5 : index
    %c0_69 = arith.constant 0 : index
    %41 = vector.load %arg2[%c0_66, %c4_67, %c5_68, %c0_69] : memref<1x6x7x32xf32, #tpu.memory_space<vmem>>, vector<1x1x1x32xf32>
    %42 = vector.shape_cast %41 : vector<1x1x1x32xf32> to vector<1x32xf32>
    %43 = tpu.concatenate %26, %28, %30, %32, %34, %36, %38, %40, %42 in 0 : vector<1x32xf32>, vector<1x32xf32>, vector<1x32xf32>, vector<1x32xf32>, vector<1x32xf32>, vector<1x32xf32>, vector<1x32xf32>, vector<1x32xf32>, vector<1x32xf32> -> vector<9x32xf32>
    %44 = arith.truncf %43 : vector<9x32xf32> to vector<9x32xbf16>
    %c1_70 = arith.constant 1 : index
    %c0_71 = arith.constant 0 : index
    %c0_72 = arith.constant 0 : index
    %45 = vector.load %arg5[%c1_70, %c0_71, %c0_72] : memref<9x32x32xbf16, #tpu.memory_space<vmem>>, vector<1x32x32xbf16>
    %46 = vector.shape_cast %45 : vector<1x32x32xbf16> to vector<32x32xbf16>
    %cst_73 = arith.constant dense<0.000000e+00> : vector<9x32xf32>
    %47 = tpu.matmul %44, %46, %cst_73 {dimension_numbers = #tpu.dot_dimension_numbers<[1], [0], [0], [1], [0, 0, 1, 1], [], []>} : vector<9x32xbf16>, vector<32x32xbf16>, vector<9x32xf32> -> vector<9x32xf32>
    %48 = arith.addf %24, %47 : vector<9x32xf32>
    %c0_74 = arith.constant 0 : index
    %c0_75 = arith.constant 0 : index
    %c2_76 = arith.constant 2 : index
    %c0_77 = arith.constant 0 : index
    %49 = vector.load %arg2[%c0_74, %c0_75, %c2_76, %c0_77] : memref<1x6x7x32xf32, #tpu.memory_space<vmem>>, vector<1x1x1x32xf32>
    %50 = vector.shape_cast %49 : vector<1x1x1x32xf32> to vector<1x32xf32>
    %c0_78 = arith.constant 0 : index
    %c2_79 = arith.constant 2 : index
    %c2_80 = arith.constant 2 : index
    %c0_81 = arith.constant 0 : index
    %51 = vector.load %arg2[%c0_78, %c2_79, %c2_80, %c0_81] : memref<1x6x7x32xf32, #tpu.memory_space<vmem>>, vector<1x1x1x32xf32>
    %52 = vector.shape_cast %51 : vector<1x1x1x32xf32> to vector<1x32xf32>
    %c0_82 = arith.constant 0 : index
    %c4_83 = arith.constant 4 : index
    %c2_84 = arith.constant 2 : index
    %c0_85 = arith.constant 0 : index
    %53 = vector.load %arg2[%c0_82, %c4_83, %c2_84, %c0_85] : memref<1x6x7x32xf32, #tpu.memory_space<vmem>>, vector<1x1x1x32xf32>
    %54 = vector.shape_cast %53 : vector<1x1x1x32xf32> to vector<1x32xf32>
    %c0_86 = arith.constant 0 : index
    %c0_87 = arith.constant 0 : index
    %c4_88 = arith.constant 4 : index
    %c0_89 = arith.constant 0 : index
    %55 = vector.load %arg2[%c0_86, %c0_87, %c4_88, %c0_89] : memref<1x6x7x32xf32, #tpu.memory_space<vmem>>, vector<1x1x1x32xf32>
    %56 = vector.shape_cast %55 : vector<1x1x1x32xf32> to vector<1x32xf32>
    %c0_90 = arith.constant 0 : index
    %c2_91 = arith.constant 2 : index
    %c4_92 = arith.constant 4 : index
    %c0_93 = arith.constant 0 : index
    %57 = vector.load %arg2[%c0_90, %c2_91, %c4_92, %c0_93] : memref<1x6x7x32xf32, #tpu.memory_space<vmem>>, vector<1x1x1x32xf32>
    %58 = vector.shape_cast %57 : vector<1x1x1x32xf32> to vector<1x32xf32>
    %c0_94 = arith.constant 0 : index
    %c4_95 = arith.constant 4 : index
    %c4_96 = arith.constant 4 : index
    %c0_97 = arith.constant 0 : index
    %59 = vector.load %arg2[%c0_94, %c4_95, %c4_96, %c0_97] : memref<1x6x7x32xf32, #tpu.memory_space<vmem>>, vector<1x1x1x32xf32>
    %60 = vector.shape_cast %59 : vector<1x1x1x32xf32> to vector<1x32xf32>
    %c0_98 = arith.constant 0 : index
    %c0_99 = arith.constant 0 : index
    %c6 = arith.constant 6 : index
    %c0_100 = arith.constant 0 : index
    %61 = vector.load %arg2[%c0_98, %c0_99, %c6, %c0_100] : memref<1x6x7x32xf32, #tpu.memory_space<vmem>>, vector<1x1x1x32xf32>
    %62 = vector.shape_cast %61 : vector<1x1x1x32xf32> to vector<1x32xf32>
    %c0_101 = arith.constant 0 : index
    %c2_102 = arith.constant 2 : index
    %c6_103 = arith.constant 6 : index
    %c0_104 = arith.constant 0 : index
    %63 = vector.load %arg2[%c0_101, %c2_102, %c6_103, %c0_104] : memref<1x6x7x32xf32, #tpu.memory_space<vmem>>, vector<1x1x1x32xf32>
    %64 = vector.shape_cast %63 : vector<1x1x1x32xf32> to vector<1x32xf32>
    %c0_105 = arith.constant 0 : index
    %c4_106 = arith.constant 4 : index
    %c6_107 = arith.constant 6 : index
    %c0_108 = arith.constant 0 : index
    %65 = vector.load %arg2[%c0_105, %c4_106, %c6_107, %c0_108] : memref<1x6x7x32xf32, #tpu.memory_space<vmem>>, vector<1x1x1x32xf32>
    %66 = vector.shape_cast %65 : vector<1x1x1x32xf32> to vector<1x32xf32>
    %67 = tpu.concatenate %50, %52, %54, %56, %58, %60, %62, %64, %66 in 0 : vector<1x32xf32>, vector<1x32xf32>, vector<1x32xf32>, vector<1x32xf32>, vector<1x32xf32>, vector<1x32xf32>, vector<1x32xf32>, vector<1x32xf32>, vector<1x32xf32> -> vector<9x32xf32>
    %68 = arith.truncf %67 : vector<9x32xf32> to vector<9x32xbf16>
    %c2_109 = arith.constant 2 : index
    %c0_110 = arith.constant 0 : index
    %c0_111 = arith.constant 0 : index
    %69 = vector.load %arg5[%c2_109, %c0_110, %c0_111] : memref<9x32x32xbf16, #tpu.memory_space<vmem>>, vector<1x32x32xbf16>
    %70 = vector.shape_cast %69 : vector<1x32x32xbf16> to vector<32x32xbf16>
    %cst_112 = arith.constant dense<0.000000e+00> : vector<9x32xf32>
    %71 = tpu.matmul %68, %70, %cst_112 {dimension_numbers = #tpu.dot_dimension_numbers<[1], [0], [0], [1], [0, 0, 1, 1], [], []>} : vector<9x32xbf16>, vector<32x32xbf16>, vector<9x32xf32> -> vector<9x32xf32>
    %72 = arith.addf %48, %71 : vector<9x32xf32>
    %c0_113 = arith.constant 0 : index
    %c1_114 = arith.constant 1 : index
    %c0_115 = arith.constant 0 : index
    %c0_116 = arith.constant 0 : index
    %73 = vector.load %arg2[%c0_113, %c1_114, %c0_115, %c0_116] : memref<1x6x7x32xf32, #tpu.memory_space<vmem>>, vector<1x1x1x32xf32>
    %74 = vector.shape_cast %73 : vector<1x1x1x32xf32> to vector<1x32xf32>
    %c0_117 = arith.constant 0 : index
    %c3_118 = arith.constant 3 : index
    %c0_119 = arith.constant 0 : index
    %c0_120 = arith.constant 0 : index
    %75 = vector.load %arg2[%c0_117, %c3_118, %c0_119, %c0_120] : memref<1x6x7x32xf32, #tpu.memory_space<vmem>>, vector<1x1x1x32xf32>
    %76 = vector.shape_cast %75 : vector<1x1x1x32xf32> to vector<1x32xf32>
    %c0_121 = arith.constant 0 : index
    %c5_122 = arith.constant 5 : index
    %c0_123 = arith.constant 0 : index
    %c0_124 = arith.constant 0 : index
    %77 = vector.load %arg2[%c0_121, %c5_122, %c0_123, %c0_124] : memref<1x6x7x32xf32, #tpu.memory_space<vmem>>, vector<1x1x1x32xf32>
    %78 = vector.shape_cast %77 : vector<1x1x1x32xf32> to vector<1x32xf32>
    %c0_125 = arith.constant 0 : index
    %c1_126 = arith.constant 1 : index
    %c2_127 = arith.constant 2 : index
    %c0_128 = arith.constant 0 : index
    %79 = vector.load %arg2[%c0_125, %c1_126, %c2_127, %c0_128] : memref<1x6x7x32xf32, #tpu.memory_space<vmem>>, vector<1x1x1x32xf32>
    %80 = vector.shape_cast %79 : vector<1x1x1x32xf32> to vector<1x32xf32>
    %c0_129 = arith.constant 0 : index
    %c3_130 = arith.constant 3 : index
    %c2_131 = arith.constant 2 : index
    %c0_132 = arith.constant 0 : index
    %81 = vector.load %arg2[%c0_129, %c3_130, %c2_131, %c0_132] : memref<1x6x7x32xf32, #tpu.memory_space<vmem>>, vector<1x1x1x32xf32>
    %82 = vector.shape_cast %81 : vector<1x1x1x32xf32> to vector<1x32xf32>
    %c0_133 = arith.constant 0 : index
    %c5_134 = arith.constant 5 : index
    %c2_135 = arith.constant 2 : index
    %c0_136 = arith.constant 0 : index
    %83 = vector.load %arg2[%c0_133, %c5_134, %c2_135, %c0_136] : memref<1x6x7x32xf32, #tpu.memory_space<vmem>>, vector<1x1x1x32xf32>
    %84 = vector.shape_cast %83 : vector<1x1x1x32xf32> to vector<1x32xf32>
    %c0_137 = arith.constant 0 : index
    %c1_138 = arith.constant 1 : index
    %c4_139 = arith.constant 4 : index
    %c0_140 = arith.constant 0 : index
    %85 = vector.load %arg2[%c0_137, %c1_138, %c4_139, %c0_140] : memref<1x6x7x32xf32, #tpu.memory_space<vmem>>, vector<1x1x1x32xf32>
    %86 = vector.shape_cast %85 : vector<1x1x1x32xf32> to vector<1x32xf32>
    %c0_141 = arith.constant 0 : index
    %c3_142 = arith.constant 3 : index
    %c4_143 = arith.constant 4 : index
    %c0_144 = arith.constant 0 : index
    %87 = vector.load %arg2[%c0_141, %c3_142, %c4_143, %c0_144] : memref<1x6x7x32xf32, #tpu.memory_space<vmem>>, vector<1x1x1x32xf32>
    %88 = vector.shape_cast %87 : vector<1x1x1x32xf32> to vector<1x32xf32>
    %c0_145 = arith.constant 0 : index
    %c5_146 = arith.constant 5 : index
    %c4_147 = arith.constant 4 : index
    %c0_148 = arith.constant 0 : index
    %89 = vector.load %arg2[%c0_145, %c5_146, %c4_147, %c0_148] : memref<1x6x7x32xf32, #tpu.memory_space<vmem>>, vector<1x1x1x32xf32>
    %90 = vector.shape_cast %89 : vector<1x1x1x32xf32> to vector<1x32xf32>
    %91 = tpu.concatenate %74, %76, %78, %80, %82, %84, %86, %88, %90 in 0 : vector<1x32xf32>, vector<1x32xf32>, vector<1x32xf32>, vector<1x32xf32>, vector<1x32xf32>, vector<1x32xf32>, vector<1x32xf32>, vector<1x32xf32>, vector<1x32xf32> -> vector<9x32xf32>
    %92 = arith.truncf %91 : vector<9x32xf32> to vector<9x32xbf16>
    %c3_149 = arith.constant 3 : index
    %c0_150 = arith.constant 0 : index
    %c0_151 = arith.constant 0 : index
    %93 = vector.load %arg5[%c3_149, %c0_150, %c0_151] : memref<9x32x32xbf16, #tpu.memory_space<vmem>>, vector<1x32x32xbf16>
    %94 = vector.shape_cast %93 : vector<1x32x32xbf16> to vector<32x32xbf16>
    %cst_152 = arith.constant dense<0.000000e+00> : vector<9x32xf32>
    %95 = tpu.matmul %92, %94, %cst_152 {dimension_numbers = #tpu.dot_dimension_numbers<[1], [0], [0], [1], [0, 0, 1, 1], [], []>} : vector<9x32xbf16>, vector<32x32xbf16>, vector<9x32xf32> -> vector<9x32xf32>
    %96 = arith.addf %72, %95 : vector<9x32xf32>
    %c0_153 = arith.constant 0 : index
    %c1_154 = arith.constant 1 : index
    %c1_155 = arith.constant 1 : index
    %c0_156 = arith.constant 0 : index
    %97 = vector.load %arg2[%c0_153, %c1_154, %c1_155, %c0_156] : memref<1x6x7x32xf32, #tpu.memory_space<vmem>>, vector<1x1x1x32xf32>
    %98 = vector.shape_cast %97 : vector<1x1x1x32xf32> to vector<1x32xf32>
    %c0_157 = arith.constant 0 : index
    %c3_158 = arith.constant 3 : index
    %c1_159 = arith.constant 1 : index
    %c0_160 = arith.constant 0 : index
    %99 = vector.load %arg2[%c0_157, %c3_158, %c1_159, %c0_160] : memref<1x6x7x32xf32, #tpu.memory_space<vmem>>, vector<1x1x1x32xf32>
    %100 = vector.shape_cast %99 : vector<1x1x1x32xf32> to vector<1x32xf32>
    %c0_161 = arith.constant 0 : index
    %c5_162 = arith.constant 5 : index
    %c1_163 = arith.constant 1 : index
    %c0_164 = arith.constant 0 : index
    %101 = vector.load %arg2[%c0_161, %c5_162, %c1_163, %c0_164] : memref<1x6x7x32xf32, #tpu.memory_space<vmem>>, vector<1x1x1x32xf32>
    %102 = vector.shape_cast %101 : vector<1x1x1x32xf32> to vector<1x32xf32>
    %c0_165 = arith.constant 0 : index
    %c1_166 = arith.constant 1 : index
    %c3_167 = arith.constant 3 : index
    %c0_168 = arith.constant 0 : index
    %103 = vector.load %arg2[%c0_165, %c1_166, %c3_167, %c0_168] : memref<1x6x7x32xf32, #tpu.memory_space<vmem>>, vector<1x1x1x32xf32>
    %104 = vector.shape_cast %103 : vector<1x1x1x32xf32> to vector<1x32xf32>
    %c0_169 = arith.constant 0 : index
    %c3_170 = arith.constant 3 : index
    %c3_171 = arith.constant 3 : index
    %c0_172 = arith.constant 0 : index
    %105 = vector.load %arg2[%c0_169, %c3_170, %c3_171, %c0_172] : memref<1x6x7x32xf32, #tpu.memory_space<vmem>>, vector<1x1x1x32xf32>
    %106 = vector.shape_cast %105 : vector<1x1x1x32xf32> to vector<1x32xf32>
    %c0_173 = arith.constant 0 : index
    %c5_174 = arith.constant 5 : index
    %c3_175 = arith.constant 3 : index
    %c0_176 = arith.constant 0 : index
    %107 = vector.load %arg2[%c0_173, %c5_174, %c3_175, %c0_176] : memref<1x6x7x32xf32, #tpu.memory_space<vmem>>, vector<1x1x1x32xf32>
    %108 = vector.shape_cast %107 : vector<1x1x1x32xf32> to vector<1x32xf32>
    %c0_177 = arith.constant 0 : index
    %c1_178 = arith.constant 1 : index
    %c5_179 = arith.constant 5 : index
    %c0_180 = arith.constant 0 : index
    %109 = vector.load %arg2[%c0_177, %c1_178, %c5_179, %c0_180] : memref<1x6x7x32xf32, #tpu.memory_space<vmem>>, vector<1x1x1x32xf32>
    %110 = vector.shape_cast %109 : vector<1x1x1x32xf32> to vector<1x32xf32>
    %c0_181 = arith.constant 0 : index
    %c3_182 = arith.constant 3 : index
    %c5_183 = arith.constant 5 : index
    %c0_184 = arith.constant 0 : index
    %111 = vector.load %arg2[%c0_181, %c3_182, %c5_183, %c0_184] : memref<1x6x7x32xf32, #tpu.memory_space<vmem>>, vector<1x1x1x32xf32>
    %112 = vector.shape_cast %111 : vector<1x1x1x32xf32> to vector<1x32xf32>
    %c0_185 = arith.constant 0 : index
    %c5_186 = arith.constant 5 : index
    %c5_187 = arith.constant 5 : index
    %c0_188 = arith.constant 0 : index
    %113 = vector.load %arg2[%c0_185, %c5_186, %c5_187, %c0_188] : memref<1x6x7x32xf32, #tpu.memory_space<vmem>>, vector<1x1x1x32xf32>
    %114 = vector.shape_cast %113 : vector<1x1x1x32xf32> to vector<1x32xf32>
    %115 = tpu.concatenate %98, %100, %102, %104, %106, %108, %110, %112, %114 in 0 : vector<1x32xf32>, vector<1x32xf32>, vector<1x32xf32>, vector<1x32xf32>, vector<1x32xf32>, vector<1x32xf32>, vector<1x32xf32>, vector<1x32xf32>, vector<1x32xf32> -> vector<9x32xf32>
    %116 = arith.truncf %115 : vector<9x32xf32> to vector<9x32xbf16>
    %c4_189 = arith.constant 4 : index
    %c0_190 = arith.constant 0 : index
    %c0_191 = arith.constant 0 : index
    %117 = vector.load %arg5[%c4_189, %c0_190, %c0_191] : memref<9x32x32xbf16, #tpu.memory_space<vmem>>, vector<1x32x32xbf16>
    %118 = vector.shape_cast %117 : vector<1x32x32xbf16> to vector<32x32xbf16>
    %cst_192 = arith.constant dense<0.000000e+00> : vector<9x32xf32>
    %119 = tpu.matmul %116, %118, %cst_192 {dimension_numbers = #tpu.dot_dimension_numbers<[1], [0], [0], [1], [0, 0, 1, 1], [], []>} : vector<9x32xbf16>, vector<32x32xbf16>, vector<9x32xf32> -> vector<9x32xf32>
    %120 = arith.addf %96, %119 : vector<9x32xf32>
    %c0_193 = arith.constant 0 : index
    %c1_194 = arith.constant 1 : index
    %c2_195 = arith.constant 2 : index
    %c0_196 = arith.constant 0 : index
    %121 = vector.load %arg2[%c0_193, %c1_194, %c2_195, %c0_196] : memref<1x6x7x32xf32, #tpu.memory_space<vmem>>, vector<1x1x1x32xf32>
    %122 = vector.shape_cast %121 : vector<1x1x1x32xf32> to vector<1x32xf32>
    %c0_197 = arith.constant 0 : index
    %c3_198 = arith.constant 3 : index
    %c2_199 = arith.constant 2 : index
    %c0_200 = arith.constant 0 : index
    %123 = vector.load %arg2[%c0_197, %c3_198, %c2_199, %c0_200] : memref<1x6x7x32xf32, #tpu.memory_space<vmem>>, vector<1x1x1x32xf32>
    %124 = vector.shape_cast %123 : vector<1x1x1x32xf32> to vector<1x32xf32>
    %c0_201 = arith.constant 0 : index
    %c5_202 = arith.constant 5 : index
    %c2_203 = arith.constant 2 : index
    %c0_204 = arith.constant 0 : index
    %125 = vector.load %arg2[%c0_201, %c5_202, %c2_203, %c0_204] : memref<1x6x7x32xf32, #tpu.memory_space<vmem>>, vector<1x1x1x32xf32>
    %126 = vector.shape_cast %125 : vector<1x1x1x32xf32> to vector<1x32xf32>
    %c0_205 = arith.constant 0 : index
    %c1_206 = arith.constant 1 : index
    %c4_207 = arith.constant 4 : index
    %c0_208 = arith.constant 0 : index
    %127 = vector.load %arg2[%c0_205, %c1_206, %c4_207, %c0_208] : memref<1x6x7x32xf32, #tpu.memory_space<vmem>>, vector<1x1x1x32xf32>
    %128 = vector.shape_cast %127 : vector<1x1x1x32xf32> to vector<1x32xf32>
    %c0_209 = arith.constant 0 : index
    %c3_210 = arith.constant 3 : index
    %c4_211 = arith.constant 4 : index
    %c0_212 = arith.constant 0 : index
    %129 = vector.load %arg2[%c0_209, %c3_210, %c4_211, %c0_212] : memref<1x6x7x32xf32, #tpu.memory_space<vmem>>, vector<1x1x1x32xf32>
    %130 = vector.shape_cast %129 : vector<1x1x1x32xf32> to vector<1x32xf32>
    %c0_213 = arith.constant 0 : index
    %c5_214 = arith.constant 5 : index
    %c4_215 = arith.constant 4 : index
    %c0_216 = arith.constant 0 : index
    %131 = vector.load %arg2[%c0_213, %c5_214, %c4_215, %c0_216] : memref<1x6x7x32xf32, #tpu.memory_space<vmem>>, vector<1x1x1x32xf32>
    %132 = vector.shape_cast %131 : vector<1x1x1x32xf32> to vector<1x32xf32>
    %c0_217 = arith.constant 0 : index
    %c1_218 = arith.constant 1 : index
    %c6_219 = arith.constant 6 : index
    %c0_220 = arith.constant 0 : index
    %133 = vector.load %arg2[%c0_217, %c1_218, %c6_219, %c0_220] : memref<1x6x7x32xf32, #tpu.memory_space<vmem>>, vector<1x1x1x32xf32>
    %134 = vector.shape_cast %133 : vector<1x1x1x32xf32> to vector<1x32xf32>
    %c0_221 = arith.constant 0 : index
    %c3_222 = arith.constant 3 : index
    %c6_223 = arith.constant 6 : index
    %c0_224 = arith.constant 0 : index
    %135 = vector.load %arg2[%c0_221, %c3_222, %c6_223, %c0_224] : memref<1x6x7x32xf32, #tpu.memory_space<vmem>>, vector<1x1x1x32xf32>
    %136 = vector.shape_cast %135 : vector<1x1x1x32xf32> to vector<1x32xf32>
    %c0_225 = arith.constant 0 : index
    %c5_226 = arith.constant 5 : index
    %c6_227 = arith.constant 6 : index
    %c0_228 = arith.constant 0 : index
    %137 = vector.load %arg2[%c0_225, %c5_226, %c6_227, %c0_228] : memref<1x6x7x32xf32, #tpu.memory_space<vmem>>, vector<1x1x1x32xf32>
    %138 = vector.shape_cast %137 : vector<1x1x1x32xf32> to vector<1x32xf32>
    %139 = tpu.concatenate %122, %124, %126, %128, %130, %132, %134, %136, %138 in 0 : vector<1x32xf32>, vector<1x32xf32>, vector<1x32xf32>, vector<1x32xf32>, vector<1x32xf32>, vector<1x32xf32>, vector<1x32xf32>, vector<1x32xf32>, vector<1x32xf32> -> vector<9x32xf32>
    %140 = arith.truncf %139 : vector<9x32xf32> to vector<9x32xbf16>
    %c5_229 = arith.constant 5 : index
    %c0_230 = arith.constant 0 : index
    %c0_231 = arith.constant 0 : index
    %141 = vector.load %arg5[%c5_229, %c0_230, %c0_231] : memref<9x32x32xbf16, #tpu.memory_space<vmem>>, vector<1x32x32xbf16>
    %142 = vector.shape_cast %141 : vector<1x32x32xbf16> to vector<32x32xbf16>
    %cst_232 = arith.constant dense<0.000000e+00> : vector<9x32xf32>
    %143 = tpu.matmul %140, %142, %cst_232 {dimension_numbers = #tpu.dot_dimension_numbers<[1], [0], [0], [1], [0, 0, 1, 1], [], []>} : vector<9x32xbf16>, vector<32x32xbf16>, vector<9x32xf32> -> vector<9x32xf32>
    %144 = arith.addf %120, %143 : vector<9x32xf32>
    %c0_233 = arith.constant 0 : index
    %c2_234 = arith.constant 2 : index
    %c0_235 = arith.constant 0 : index
    %c0_236 = arith.constant 0 : index
    %145 = vector.load %arg2[%c0_233, %c2_234, %c0_235, %c0_236] : memref<1x6x7x32xf32, #tpu.memory_space<vmem>>, vector<1x1x1x32xf32>
    %146 = vector.shape_cast %145 : vector<1x1x1x32xf32> to vector<1x32xf32>
    %c0_237 = arith.constant 0 : index
    %c4_238 = arith.constant 4 : index
    %c0_239 = arith.constant 0 : index
    %c0_240 = arith.constant 0 : index
    %147 = vector.load %arg2[%c0_237, %c4_238, %c0_239, %c0_240] : memref<1x6x7x32xf32, #tpu.memory_space<vmem>>, vector<1x1x1x32xf32>
    %148 = vector.shape_cast %147 : vector<1x1x1x32xf32> to vector<1x32xf32>
    %c0_241 = arith.constant 0 : index
    %c0_242 = arith.constant 0 : index
    %c0_243 = arith.constant 0 : index
    %c0_244 = arith.constant 0 : index
    %149 = vector.load %arg3[%c0_241, %c0_242, %c0_243, %c0_244] : memref<1x1x7x32xf32, #tpu.memory_space<vmem>>, vector<1x1x1x32xf32>
    %150 = vector.shape_cast %149 : vector<1x1x1x32xf32> to vector<1x32xf32>
    %c0_245 = arith.constant 0 : index
    %c2_246 = arith.constant 2 : index
    %c2_247 = arith.constant 2 : index
    %c0_248 = arith.constant 0 : index
    %151 = vector.load %arg2[%c0_245, %c2_246, %c2_247, %c0_248] : memref<1x6x7x32xf32, #tpu.memory_space<vmem>>, vector<1x1x1x32xf32>
    %152 = vector.shape_cast %151 : vector<1x1x1x32xf32> to vector<1x32xf32>
    %c0_249 = arith.constant 0 : index
    %c4_250 = arith.constant 4 : index
    %c2_251 = arith.constant 2 : index
    %c0_252 = arith.constant 0 : index
    %153 = vector.load %arg2[%c0_249, %c4_250, %c2_251, %c0_252] : memref<1x6x7x32xf32, #tpu.memory_space<vmem>>, vector<1x1x1x32xf32>
    %154 = vector.shape_cast %153 : vector<1x1x1x32xf32> to vector<1x32xf32>
    %c0_253 = arith.constant 0 : index
    %c0_254 = arith.constant 0 : index
    %c2_255 = arith.constant 2 : index
    %c0_256 = arith.constant 0 : index
    %155 = vector.load %arg3[%c0_253, %c0_254, %c2_255, %c0_256] : memref<1x1x7x32xf32, #tpu.memory_space<vmem>>, vector<1x1x1x32xf32>
    %156 = vector.shape_cast %155 : vector<1x1x1x32xf32> to vector<1x32xf32>
    %c0_257 = arith.constant 0 : index
    %c2_258 = arith.constant 2 : index
    %c4_259 = arith.constant 4 : index
    %c0_260 = arith.constant 0 : index
    %157 = vector.load %arg2[%c0_257, %c2_258, %c4_259, %c0_260] : memref<1x6x7x32xf32, #tpu.memory_space<vmem>>, vector<1x1x1x32xf32>
    %158 = vector.shape_cast %157 : vector<1x1x1x32xf32> to vector<1x32xf32>
    %c0_261 = arith.constant 0 : index
    %c4_262 = arith.constant 4 : index
    %c4_263 = arith.constant 4 : index
    %c0_264 = arith.constant 0 : index
    %159 = vector.load %arg2[%c0_261, %c4_262, %c4_263, %c0_264] : memref<1x6x7x32xf32, #tpu.memory_space<vmem>>, vector<1x1x1x32xf32>
    %160 = vector.shape_cast %159 : vector<1x1x1x32xf32> to vector<1x32xf32>
    %c0_265 = arith.constant 0 : index
    %c0_266 = arith.constant 0 : index
    %c4_267 = arith.constant 4 : index
    %c0_268 = arith.constant 0 : index
    %161 = vector.load %arg3[%c0_265, %c0_266, %c4_267, %c0_268] : memref<1x1x7x32xf32, #tpu.memory_space<vmem>>, vector<1x1x1x32xf32>
    %162 = vector.shape_cast %161 : vector<1x1x1x32xf32> to vector<1x32xf32>
    %163 = tpu.concatenate %146, %148, %150, %152, %154, %156, %158, %160, %162 in 0 : vector<1x32xf32>, vector<1x32xf32>, vector<1x32xf32>, vector<1x32xf32>, vector<1x32xf32>, vector<1x32xf32>, vector<1x32xf32>, vector<1x32xf32>, vector<1x32xf32> -> vector<9x32xf32>
    %164 = arith.truncf %163 : vector<9x32xf32> to vector<9x32xbf16>
    %c6_269 = arith.constant 6 : index
    %c0_270 = arith.constant 0 : index
    %c0_271 = arith.constant 0 : index
    %165 = vector.load %arg5[%c6_269, %c0_270, %c0_271] : memref<9x32x32xbf16, #tpu.memory_space<vmem>>, vector<1x32x32xbf16>
    %166 = vector.shape_cast %165 : vector<1x32x32xbf16> to vector<32x32xbf16>
    %cst_272 = arith.constant dense<0.000000e+00> : vector<9x32xf32>
    %167 = tpu.matmul %164, %166, %cst_272 {dimension_numbers = #tpu.dot_dimension_numbers<[1], [0], [0], [1], [0, 0, 1, 1], [], []>} : vector<9x32xbf16>, vector<32x32xbf16>, vector<9x32xf32> -> vector<9x32xf32>
    %168 = arith.addf %144, %167 : vector<9x32xf32>
    %c0_273 = arith.constant 0 : index
    %c2_274 = arith.constant 2 : index
    %c1_275 = arith.constant 1 : index
    %c0_276 = arith.constant 0 : index
    %169 = vector.load %arg2[%c0_273, %c2_274, %c1_275, %c0_276] : memref<1x6x7x32xf32, #tpu.memory_space<vmem>>, vector<1x1x1x32xf32>
    %170 = vector.shape_cast %169 : vector<1x1x1x32xf32> to vector<1x32xf32>
    %c0_277 = arith.constant 0 : index
    %c4_278 = arith.constant 4 : index
    %c1_279 = arith.constant 1 : index
    %c0_280 = arith.constant 0 : index
    %171 = vector.load %arg2[%c0_277, %c4_278, %c1_279, %c0_280] : memref<1x6x7x32xf32, #tpu.memory_space<vmem>>, vector<1x1x1x32xf32>
    %172 = vector.shape_cast %171 : vector<1x1x1x32xf32> to vector<1x32xf32>
    %c0_281 = arith.constant 0 : index
    %c0_282 = arith.constant 0 : index
    %c1_283 = arith.constant 1 : index
    %c0_284 = arith.constant 0 : index
    %173 = vector.load %arg3[%c0_281, %c0_282, %c1_283, %c0_284] : memref<1x1x7x32xf32, #tpu.memory_space<vmem>>, vector<1x1x1x32xf32>
    %174 = vector.shape_cast %173 : vector<1x1x1x32xf32> to vector<1x32xf32>
    %c0_285 = arith.constant 0 : index
    %c2_286 = arith.constant 2 : index
    %c3_287 = arith.constant 3 : index
    %c0_288 = arith.constant 0 : index
    %175 = vector.load %arg2[%c0_285, %c2_286, %c3_287, %c0_288] : memref<1x6x7x32xf32, #tpu.memory_space<vmem>>, vector<1x1x1x32xf32>
    %176 = vector.shape_cast %175 : vector<1x1x1x32xf32> to vector<1x32xf32>
    %c0_289 = arith.constant 0 : index
    %c4_290 = arith.constant 4 : index
    %c3_291 = arith.constant 3 : index
    %c0_292 = arith.constant 0 : index
    %177 = vector.load %arg2[%c0_289, %c4_290, %c3_291, %c0_292] : memref<1x6x7x32xf32, #tpu.memory_space<vmem>>, vector<1x1x1x32xf32>
    %178 = vector.shape_cast %177 : vector<1x1x1x32xf32> to vector<1x32xf32>
    %c0_293 = arith.constant 0 : index
    %c0_294 = arith.constant 0 : index
    %c3_295 = arith.constant 3 : index
    %c0_296 = arith.constant 0 : index
    %179 = vector.load %arg3[%c0_293, %c0_294, %c3_295, %c0_296] : memref<1x1x7x32xf32, #tpu.memory_space<vmem>>, vector<1x1x1x32xf32>
    %180 = vector.shape_cast %179 : vector<1x1x1x32xf32> to vector<1x32xf32>
    %c0_297 = arith.constant 0 : index
    %c2_298 = arith.constant 2 : index
    %c5_299 = arith.constant 5 : index
    %c0_300 = arith.constant 0 : index
    %181 = vector.load %arg2[%c0_297, %c2_298, %c5_299, %c0_300] : memref<1x6x7x32xf32, #tpu.memory_space<vmem>>, vector<1x1x1x32xf32>
    %182 = vector.shape_cast %181 : vector<1x1x1x32xf32> to vector<1x32xf32>
    %c0_301 = arith.constant 0 : index
    %c4_302 = arith.constant 4 : index
    %c5_303 = arith.constant 5 : index
    %c0_304 = arith.constant 0 : index
    %183 = vector.load %arg2[%c0_301, %c4_302, %c5_303, %c0_304] : memref<1x6x7x32xf32, #tpu.memory_space<vmem>>, vector<1x1x1x32xf32>
    %184 = vector.shape_cast %183 : vector<1x1x1x32xf32> to vector<1x32xf32>
    %c0_305 = arith.constant 0 : index
    %c0_306 = arith.constant 0 : index
    %c5_307 = arith.constant 5 : index
    %c0_308 = arith.constant 0 : index
    %185 = vector.load %arg3[%c0_305, %c0_306, %c5_307, %c0_308] : memref<1x1x7x32xf32, #tpu.memory_space<vmem>>, vector<1x1x1x32xf32>
    %186 = vector.shape_cast %185 : vector<1x1x1x32xf32> to vector<1x32xf32>
    %187 = tpu.concatenate %170, %172, %174, %176, %178, %180, %182, %184, %186 in 0 : vector<1x32xf32>, vector<1x32xf32>, vector<1x32xf32>, vector<1x32xf32>, vector<1x32xf32>, vector<1x32xf32>, vector<1x32xf32>, vector<1x32xf32>, vector<1x32xf32> -> vector<9x32xf32>
    %188 = arith.truncf %187 : vector<9x32xf32> to vector<9x32xbf16>
    %c7 = arith.constant 7 : index
    %c0_309 = arith.constant 0 : index
    %c0_310 = arith.constant 0 : index
    %189 = vector.load %arg5[%c7, %c0_309, %c0_310] : memref<9x32x32xbf16, #tpu.memory_space<vmem>>, vector<1x32x32xbf16>
    %190 = vector.shape_cast %189 : vector<1x32x32xbf16> to vector<32x32xbf16>
    %cst_311 = arith.constant dense<0.000000e+00> : vector<9x32xf32>
    %191 = tpu.matmul %188, %190, %cst_311 {dimension_numbers = #tpu.dot_dimension_numbers<[1], [0], [0], [1], [0, 0, 1, 1], [], []>} : vector<9x32xbf16>, vector<32x32xbf16>, vector<9x32xf32> -> vector<9x32xf32>
    %192 = arith.addf %168, %191 : vector<9x32xf32>
    %c0_312 = arith.constant 0 : index
    %c2_313 = arith.constant 2 : index
    %c2_314 = arith.constant 2 : index
    %c0_315 = arith.constant 0 : index
    %193 = vector.load %arg2[%c0_312, %c2_313, %c2_314, %c0_315] : memref<1x6x7x32xf32, #tpu.memory_space<vmem>>, vector<1x1x1x32xf32>
    %194 = vector.shape_cast %193 : vector<1x1x1x32xf32> to vector<1x32xf32>
    %c0_316 = arith.constant 0 : index
    %c4_317 = arith.constant 4 : index
    %c2_318 = arith.constant 2 : index
    %c0_319 = arith.constant 0 : index
    %195 = vector.load %arg2[%c0_316, %c4_317, %c2_318, %c0_319] : memref<1x6x7x32xf32, #tpu.memory_space<vmem>>, vector<1x1x1x32xf32>
    %196 = vector.shape_cast %195 : vector<1x1x1x32xf32> to vector<1x32xf32>
    %c0_320 = arith.constant 0 : index
    %c0_321 = arith.constant 0 : index
    %c2_322 = arith.constant 2 : index
    %c0_323 = arith.constant 0 : index
    %197 = vector.load %arg3[%c0_320, %c0_321, %c2_322, %c0_323] : memref<1x1x7x32xf32, #tpu.memory_space<vmem>>, vector<1x1x1x32xf32>
    %198 = vector.shape_cast %197 : vector<1x1x1x32xf32> to vector<1x32xf32>
    %c0_324 = arith.constant 0 : index
    %c2_325 = arith.constant 2 : index
    %c4_326 = arith.constant 4 : index
    %c0_327 = arith.constant 0 : index
    %199 = vector.load %arg2[%c0_324, %c2_325, %c4_326, %c0_327] : memref<1x6x7x32xf32, #tpu.memory_space<vmem>>, vector<1x1x1x32xf32>
    %200 = vector.shape_cast %199 : vector<1x1x1x32xf32> to vector<1x32xf32>
    %c0_328 = arith.constant 0 : index
    %c4_329 = arith.constant 4 : index
    %c4_330 = arith.constant 4 : index
    %c0_331 = arith.constant 0 : index
    %201 = vector.load %arg2[%c0_328, %c4_329, %c4_330, %c0_331] : memref<1x6x7x32xf32, #tpu.memory_space<vmem>>, vector<1x1x1x32xf32>
    %202 = vector.shape_cast %201 : vector<1x1x1x32xf32> to vector<1x32xf32>
    %c0_332 = arith.constant 0 : index
    %c0_333 = arith.constant 0 : index
    %c4_334 = arith.constant 4 : index
    %c0_335 = arith.constant 0 : index
    %203 = vector.load %arg3[%c0_332, %c0_333, %c4_334, %c0_335] : memref<1x1x7x32xf32, #tpu.memory_space<vmem>>, vector<1x1x1x32xf32>
    %204 = vector.shape_cast %203 : vector<1x1x1x32xf32> to vector<1x32xf32>
    %c0_336 = arith.constant 0 : index
    %c2_337 = arith.constant 2 : index
    %c6_338 = arith.constant 6 : index
    %c0_339 = arith.constant 0 : index
    %205 = vector.load %arg2[%c0_336, %c2_337, %c6_338, %c0_339] : memref<1x6x7x32xf32, #tpu.memory_space<vmem>>, vector<1x1x1x32xf32>
    %206 = vector.shape_cast %205 : vector<1x1x1x32xf32> to vector<1x32xf32>
    %c0_340 = arith.constant 0 : index
    %c4_341 = arith.constant 4 : index
    %c6_342 = arith.constant 6 : index
    %c0_343 = arith.constant 0 : index
    %207 = vector.load %arg2[%c0_340, %c4_341, %c6_342, %c0_343] : memref<1x6x7x32xf32, #tpu.memory_space<vmem>>, vector<1x1x1x32xf32>
    %208 = vector.shape_cast %207 : vector<1x1x1x32xf32> to vector<1x32xf32>
    %c0_344 = arith.constant 0 : index
    %c0_345 = arith.constant 0 : index
    %c6_346 = arith.constant 6 : index
    %c0_347 = arith.constant 0 : index
    %209 = vector.load %arg3[%c0_344, %c0_345, %c6_346, %c0_347] : memref<1x1x7x32xf32, #tpu.memory_space<vmem>>, vector<1x1x1x32xf32>
    %210 = vector.shape_cast %209 : vector<1x1x1x32xf32> to vector<1x32xf32>
    %211 = tpu.concatenate %194, %196, %198, %200, %202, %204, %206, %208, %210 in 0 : vector<1x32xf32>, vector<1x32xf32>, vector<1x32xf32>, vector<1x32xf32>, vector<1x32xf32>, vector<1x32xf32>, vector<1x32xf32>, vector<1x32xf32>, vector<1x32xf32> -> vector<9x32xf32>
    %212 = arith.truncf %211 : vector<9x32xf32> to vector<9x32xbf16>
    %c8 = arith.constant 8 : index
    %c0_348 = arith.constant 0 : index
    %c0_349 = arith.constant 0 : index
    %213 = vector.load %arg5[%c8, %c0_348, %c0_349] : memref<9x32x32xbf16, #tpu.memory_space<vmem>>, vector<1x32x32xbf16>
    %214 = vector.shape_cast %213 : vector<1x32x32xbf16> to vector<32x32xbf16>
    %cst_350 = arith.constant dense<0.000000e+00> : vector<9x32xf32>
    %215 = tpu.matmul %212, %214, %cst_350 {dimension_numbers = #tpu.dot_dimension_numbers<[1], [0], [0], [1], [0, 0, 1, 1], [], []>} : vector<9x32xbf16>, vector<32x32xbf16>, vector<9x32xf32> -> vector<9x32xf32>
    %216 = arith.addf %192, %215 : vector<9x32xf32>
    %c0_351 = arith.constant 0 : index
    %c0_352 = arith.constant 0 : index
    %217 = vector.load %arg7[%c0_351, %c0_352] : memref<1x32xf32, #tpu.memory_space<vmem>>, vector<1x32xf32>
    %218 = vector.broadcast %217 : vector<1x32xf32> to vector<9x32xf32>
    %219 = arith.addf %216, %218 : vector<9x32xf32>
    %cst_353 = arith.constant 0.000000e+00 : f32
    %220 = vector.broadcast %cst_353 : f32 to vector<9x32xf32>
    %221 = arith.maximumf %219, %220 : vector<9x32xf32>
    %cst_354 = arith.constant 0.000000e+00 : f32
    %222 = vector.broadcast %cst_354 : f32 to vector<3x32xf32>
    %223 = vector.extract_strided_slice %221 {offsets = [0, 0], sizes = [3, 32], strides = [1, 1]} : vector<9x32xf32> to vector<3x32xf32>
    %224 = arith.truncf %223 : vector<3x32xf32> to vector<3x32xbf16>
    %c0_355 = arith.constant 0 : index
    %c0_356 = arith.constant 0 : index
    %c0_357 = arith.constant 0 : index
    %225 = vector.load %arg6[%c0_355, %c0_356, %c0_357] : memref<3x32x32xbf16, #tpu.memory_space<vmem>>, vector<1x32x32xbf16>
    %226 = vector.shape_cast %225 : vector<1x32x32xbf16> to vector<32x32xbf16>
    %cst_358 = arith.constant dense<0.000000e+00> : vector<3x32xf32>
    %227 = tpu.matmul %224, %226, %cst_358 {dimension_numbers = #tpu.dot_dimension_numbers<[1], [0], [0], [1], [0, 0, 1, 1], [], []>} : vector<3x32xbf16>, vector<32x32xbf16>, vector<3x32xf32> -> vector<3x32xf32>
    %228 = arith.addf %222, %227 : vector<3x32xf32>
    %229 = vector.extract_strided_slice %221 {offsets = [3, 0], sizes = [3, 32], strides = [1, 1]} : vector<9x32xf32> to vector<3x32xf32>
    %230 = arith.truncf %229 : vector<3x32xf32> to vector<3x32xbf16>
    %c1_359 = arith.constant 1 : index
    %c0_360 = arith.constant 0 : index
    %c0_361 = arith.constant 0 : index
    %231 = vector.load %arg6[%c1_359, %c0_360, %c0_361] : memref<3x32x32xbf16, #tpu.memory_space<vmem>>, vector<1x32x32xbf16>
    %232 = vector.shape_cast %231 : vector<1x32x32xbf16> to vector<32x32xbf16>
    %cst_362 = arith.constant dense<0.000000e+00> : vector<3x32xf32>
    %233 = tpu.matmul %230, %232, %cst_362 {dimension_numbers = #tpu.dot_dimension_numbers<[1], [0], [0], [1], [0, 0, 1, 1], [], []>} : vector<3x32xbf16>, vector<32x32xbf16>, vector<3x32xf32> -> vector<3x32xf32>
    %234 = arith.addf %228, %233 : vector<3x32xf32>
    %235 = vector.extract_strided_slice %221 {offsets = [6, 0], sizes = [3, 32], strides = [1, 1]} : vector<9x32xf32> to vector<3x32xf32>
    %236 = arith.truncf %235 : vector<3x32xf32> to vector<3x32xbf16>
    %c2_363 = arith.constant 2 : index
    %c0_364 = arith.constant 0 : index
    %c0_365 = arith.constant 0 : index
    %237 = vector.load %arg6[%c2_363, %c0_364, %c0_365] : memref<3x32x32xbf16, #tpu.memory_space<vmem>>, vector<1x32x32xbf16>
    %238 = vector.shape_cast %237 : vector<1x32x32xbf16> to vector<32x32xbf16>
    %cst_366 = arith.constant dense<0.000000e+00> : vector<3x32xf32>
    %239 = tpu.matmul %236, %238, %cst_366 {dimension_numbers = #tpu.dot_dimension_numbers<[1], [0], [0], [1], [0, 0, 1, 1], [], []>} : vector<3x32xbf16>, vector<32x32xbf16>, vector<3x32xf32> -> vector<3x32xf32>
    %240 = arith.addf %234, %239 : vector<3x32xf32>
    %c0_367 = arith.constant 0 : index
    %c0_368 = arith.constant 0 : index
    %241 = vector.load %arg8[%c0_367, %c0_368] : memref<1x32xf32, #tpu.memory_space<vmem>>, vector<1x32xf32>
    %242 = vector.broadcast %241 : vector<1x32xf32> to vector<3x32xf32>
    %243 = arith.addf %240, %242 : vector<3x32xf32>
    %cst_369 = arith.constant 5.65685415 : f32
    %244 = vector.broadcast %cst_369 : f32 to vector<3x32xf32>
    %245 = arith.mulf %243, %244 : vector<3x32xf32>
    %c0_370 = arith.constant 0 : index
    %c0_371 = arith.constant 0 : index
    %246 = vector.load %arg4[%c0_370, %c0_371] : memref<3x32xf32, #tpu.memory_space<vmem>>, vector<3x32xf32>
    %247 = arith.addf %245, %246 : vector<3x32xf32>
    %c0_372 = arith.constant 0 : index
    %c0_373 = arith.constant 0 : index
    %c0_374 = arith.constant 0 : index
    %248 = vector.load %arg9[%c0_372, %c0_373, %c0_374] : memref<1x3x32xf32, #tpu.memory_space<vmem>>, vector<1x3x32xf32>
    %249 = vector.shape_cast %248 : vector<1x3x32xf32> to vector<3x32xf32>
    %250 = vector.shape_cast %247 : vector<3x32xf32> to vector<1x3x32xf32>
    tpu.vector_store %arg9[%c0_372, %c0_373, %c0_374], %250 {strides = array<i32>} : memref<1x3x32xf32, #tpu.memory_space<vmem>>, vector<1x3x32xf32>,
    return
  }
  func.func @transform_0(%arg0: i32, %arg1: i32) -> (i32, i32, i32, i32) {
    %c0_i32 = arith.constant 0 : i32
    %c0_i32_0 = arith.constant 0 : i32
    %c0_i32_1 = arith.constant 0 : i32
    return %arg0, %arg1, %c0_i32, %c0_i32_0 : i32, i32, i32, i32
  }
  func.func @transform_1(%arg0: i32, %arg1: i32) -> (i32, i32, i32, i32) {
    %c1_i32 = arith.constant 1 : i32
    %0 = arith.addi %arg1, %c1_i32 : i32
    %c6_i32 = arith.constant 6 : i32
    %1 = arith.muli %c6_i32, %0 : i32
    %c6_i32_0 = arith.constant 6 : i32
    %2 = arith.minsi %1, %c6_i32_0 : i32
    %c0_i32 = arith.constant 0 : i32
    %c0_i32_1 = arith.constant 0 : i32
    %c0_i32_2 = arith.constant 0 : i32
    return %arg0, %2, %c0_i32, %c0_i32_1 : i32, i32, i32, i32
  }
  func.func @transform_2(%arg0: i32, %arg1: i32) -> (i32, i32) {
    %c0_i32 = arith.constant 0 : i32
    %c0_i32_0 = arith.constant 0 : i32
    return %arg1, %c0_i32 : i32, i32
  }
  func.func @transform_3(%arg0: i32, %arg1: i32) -> (i32, i32, i32) {
    %c0_i32 = arith.constant 0 : i32
    %c0_i32_0 = arith.constant 0 : i32
    %c0_i32_1 = arith.constant 0 : i32
    %c0_i32_2 = arith.constant 0 : i32
    return %c0_i32, %c0_i32_0, %c0_i32_1 : i32, i32, i32
  }
  func.func @transform_4(%arg0: i32, %arg1: i32) -> (i32, i32, i32) {
    %c0_i32 = arith.constant 0 : i32
    %c0_i32_0 = arith.constant 0 : i32
    %c0_i32_1 = arith.constant 0 : i32
    %c0_i32_2 = arith.constant 0 : i32
    return %c0_i32, %c0_i32_0, %c0_i32_1 : i32, i32, i32
  }
  func.func @transform_5(%arg0: i32, %arg1: i32) -> (i32, i32) {
    %c0_i32 = arith.constant 0 : i32
    %c0_i32_0 = arith.constant 0 : i32
    %c0_i32_1 = arith.constant 0 : i32
    return %c0_i32, %c0_i32_0 : i32, i32
  }
  func.func @transform_6(%arg0: i32, %arg1: i32) -> (i32, i32) {
    %c0_i32 = arith.constant 0 : i32
    %c0_i32_0 = arith.constant 0 : i32
    %c0_i32_1 = arith.constant 0 : i32
    return %c0_i32, %c0_i32_0 : i32, i32
  }
  func.func @transform_7(%arg0: i32, %arg1: i32) -> (i32, i32, i32) {
    %c0_i32 = arith.constant 0 : i32
    %c0_i32_0 = arith.constant 0 : i32
    return %arg0, %arg1, %c0_i32 : i32, i32, i32
  }
}

</mosaic_0001>

<bundles_post_ra>
// kernel: conv2d_subsampling4_forward.2
= control target key start
LH: loop header
LB: loop body
LE: loop exit
PB: predicated region body
PF: predicated region fallthrough
CT: control target
= control target key end

     0   :  { %s852_s12 = smov 0   ;;  %s854_s13 = smov 0   ;;  %s1105_s0 = inlined_call_operand.vmem [shape: f32[2,49,9], index: 0, kind: input, shape index: {}]   ;;  %s1106_s1 = inlined_call_operand.vmem [shape: f32[9,32], index: 1, kind: input, shape index: {}]   ;;  %s1107_s2 = inlined_call_operand.vmem [shape: f32[1,32], index: 2, kind: input, shape index: {}]   ;;  %s1108_s3 = inlined_call_operand.vmem [shape: f32[2,49,32], index: 3, kind: output, shape index: {}]  }
   0x1   :  { %s856_s14 = smov 0  }
   0x2 LB: > { %s25_s15 = sadd.s32 1, %s817_s13  ;;  %p731_p0 = scmp.ge.s32.totalorder %s821_s14, 1  ;;  %s821_s14 = sphi %s856_s14, %s13_s14   ;;  %s817_s13 = sphi %s854_s13, %s1110_s13   ;;  %s813_s12 = sphi %s852_s12, %s1109_s12  }
   0x3   : > { %p27_p1 = scmp.ge.s32.totalorder %s25_s15, 2  ;;  %p158_p2 = scmp.lt.s32.totalorder %s821_s14, 3 }
   0x5   : > { %s1112_s15 = smov (%p27_p1, %s25_s15), 0  ;;  %p159_p3 = pnand %p731_p0, %p158_p2 }
   0x6   : > { %p191_p4 = scmp.lt.s32.totalorder (!%p159_p3), %s813_s12, 1 }
   0x7   : > { %162 = sbr.rel (%p159_p3) target bundleno = 334 (0x14e), region = 32 }
   0xc   : > { %v823_v0 = vmov 0   ;;  %s1114_s12 = smov (!%p191_p4, %s813_s12), 1  ;;  %v824_v8 = vmov 1   ;;  %v825_v9 = vmov 2   ;;  %v826_v10 = vmov 3   ;;  %v936_v17 = vld [vmem:[%s1106_s1] sm:$0xff] }
   0xd   : > { %772 = vset.pattern.permute.xlu2 %v823_v0  ;;  %771 = vset.pattern.permute.xlu1 %v823_v0  ;;  %s736_s16 = smul.u32 56, %s1114_s12  ;;  %v827_v11 = vmov 4   ;;  %v828_v12 = vmov 5   ;;  %v829_v14 = vmov 6   ;;  %v830_v18 = vmov 7  }
   0xe   : > { %770 = vset.pattern.permute.xlu0 %v823_v0  ;;  %v254_v19 = vperm.slane %v936_v17, 0  ;;  %v297_v20 = vperm.slane %v936_v17, 1  ;;  %v831_v27 = vmov 8   ;;  %v340_v43 = vperm.slane %v936_v17, 2 }
   0xf   : > { %s198_s19 = scalar_lea.vmem %s1105_s0, %s736_s16  ;;  %v383_v57 = vperm.slane %v936_v17, 3  ;;  %s1049_s28 = scalar_lea.vmem %s1108_s3, %s736_s16  ;;  %vm631_vm0 = vcmask 261120   ;;  %vm638_vm1 = vcmask 253952  }
  0x10   : > { %v878_v1 = vld [vmem:[%s198_s19 + $0x20] sm:$0xff]  ;;  %v880_v2 = vld [vmem:[%s198_s19 + $0x10] sm:$0xff]  ;;  %v887_v4 = vld [vmem:[%s198_s19 + $0x28] sm:$0xff] }
  0x11   : > { %v882_v3 = vld [vmem:[%s198_s19] sm:$0xff]  ;;  %241 = vperm.xlu2 %772, %v878_v1   ;;  %231 = vperm.xlu1 %771, %v880_v2   ;;  %v889_v5 = vld [vmem:[%s198_s19 + $0x18] sm:$0xff]  ;;  %v891_v6 = vld [vmem:[%s198_s19 + $0x8] sm:$0xff] }
  0x12   : > { %221 = vperm.xlu0 %770, %v882_v3   ;;  %v896_v7 = vld [vmem:[%s198_s19 + $0x30] sm:$0x1] }
  0x19   : > { %246 = vperm.xlu2 %772, %v887_v4   ;;  %236 = vperm.xlu1 %771, %v889_v5  }
  0x1a   : > { %226 = vperm.xlu0 %770, %v891_v6  }
  0x21   : > { %774 = vset.pattern.permute.xlu2 %v824_v8  ;;  %773 = vset.pattern.permute.xlu1 %v824_v8 }
  0x22   : > { %251 = vperm.xlu0 %770, %v896_v7   ;;  %274 = vperm.xlu2 %774, %v891_v6  }
  0x23   : > { %270 = vperm.xlu1 %773, %v882_v3  }
  0x2a   : > { %775 = vset.pattern.permute.xlu0 %v824_v8  ;;  %286 = vperm.xlu2 %774, %v878_v1  }
  0x2b   : > { %282 = vperm.xlu1 %773, %v889_v5   ;;  %278 = vperm.xlu0 %775, %v880_v2  }
  0x32   : > { %294 = vperm.xlu2 %774, %v896_v7  }
  0x33   : > { %290 = vperm.xlu1 %773, %v887_v4   ;;  %776 = vset.pattern.permute.xlu0 %v825_v9 }
  0x34   : > { %313 = vperm.xlu0 %776, %v882_v3  }
  0x3a   : > { %778 = vset.pattern.permute.xlu2 %v825_v9 }
  0x3b   : > { %777 = vset.pattern.permute.xlu1 %v825_v9  ;;  %321 = vperm.xlu2 %778, %v880_v2  }
  0x3c   : > { %317 = vperm.xlu1 %777, %v891_v6   ;;  %333 = vperm.xlu0 %776, %v887_v4  }
  0x43   : > { %329 = vperm.xlu2 %778, %v878_v1  }
  0x44   : > { %325 = vperm.xlu1 %777, %v889_v5   ;;  %780 = vset.pattern.permute.xlu0 %v826_v10 }
  0x45   : > { %360 = vperm.xlu0 %780, %v891_v6  }
  0x4b   : > { %779 = vset.pattern.permute.xlu2 %v826_v10 }
  0x4c   : > { %337 = vperm.xlu1 %777, %v896_v7   ;;  %356 = vperm.xlu2 %779, %v882_v3  }
  0x4d   : > { %380 = vperm.xlu0 %780, %v896_v7  }
  0x54   : > { %781 = vset.pattern.permute.xlu1 %v826_v10  ;;  %368 = vperm.xlu2 %779, %v889_v5  }
  0x55   : > { %364 = vperm.xlu1 %781, %v880_v2   ;;  %784 = vset.pattern.permute.xlu0 %v827_v11 }
  0x56   : > { %407 = vperm.xlu0 %784, %v880_v2  }
  0x5c   : > { %376 = vperm.xlu2 %779, %v887_v4  }
  0x5d   : > { %372 = vperm.xlu1 %781, %v878_v1  }
  0x5e   : > { %785 = vset.pattern.permute.xlu0 %v828_v12 }
  0x5f   : > { %442 = vperm.xlu0 %785, %v882_v3  }
  0x64   : > { %783 = vset.pattern.permute.xlu2 %v827_v11 }
  0x65   : > { %782 = vset.pattern.permute.xlu1 %v827_v11  ;;  %403 = vperm.xlu2 %783, %v891_v6  }
  0x66   : > { %399 = vperm.xlu1 %782, %v882_v3  }
  0x67   : > { %462 = vperm.xlu0 %785, %v887_v4  }
  0x6b   : > { %v242_v13 = vpop.permute.xlu2 %241 }
  0x6c   : > { %v259_v21 = vmul.f32 %v254_v19, %v242_v13 }
  0x6d   : > { %415 = vperm.xlu2 %783, %v878_v1  }
  0x6e   : > { %411 = vperm.xlu1 %782, %v889_v5  }
  0x6f   : > { %789 = vset.pattern.permute.xlu0 %v829_v14 }
  0x70   : > { %489 = vperm.xlu0 %789, %v891_v6  }
  0x73   : > { %v928_v15 = vpop.permute.xlu2 %246 }
  0x74   : > { %v260_v59 = vmul.f32 %v254_v19, %v928_v15 }
  0x75   : > { %423 = vperm.xlu2 %783, %v896_v7  }
  0x76   : > { %419 = vperm.xlu1 %782, %v887_v4  }
  0x78   : > { %509 = vperm.xlu0 %789, %v896_v7  }
  0x7c   : > { %v275_v16 = vpop.permute.xlu2 %274 }
  0x7d   : > { %787 = vset.pattern.permute.xlu2 %v828_v12  ;;  %v299_v28 = vmul.f32 %v297_v20, %v275_v16 }
  0x7e   : > { %786 = vset.pattern.permute.xlu1 %v828_v12  ;;  %450 = vperm.xlu2 %787, %v880_v2  }
  0x7f   : > { %446 = vperm.xlu1 %786, %v891_v6  }
  0x80   : > { %793 = vset.pattern.permute.xlu0 %v830_v18 }
  0x81   : > { %536 = vperm.xlu0 %793, %v880_v2  }
  0x83   : > { %v232_v22 = vpop.permute.xlu1 %231 }
  0x84   : > { %v222_v23 = vpop.permute.xlu0 %221  ;;  %v287_v24 = vpop.permute.xlu2 %286  ;;  %v257_v44 = vmul.f32 %v254_v19, %v232_v22 }
  0x85   : > { %v302_v25 = vmul.f32 %v297_v20, %v287_v24  ;;  %v255_v35 = vmul.f32 %v254_v19, %v222_v23 }
  0x86   : > { %458 = vperm.xlu2 %787, %v878_v1  }
  0x87   : > { %v309_v26 = vadd.f32 %v302_v25, %v259_v21  ;;  %454 = vperm.xlu1 %786, %v889_v5  }
  0x89   : > { %794 = vset.pattern.permute.xlu0 %v831_v27 }
  0x8a   : > { %571 = vperm.xlu0 %794, %v882_v3  }
  0x8b   : > { %v237_v29 = vpop.permute.xlu1 %236 }
  0x8c   : > { %v227_v30 = vpop.permute.xlu0 %226  ;;  %v295_v31 = vpop.permute.xlu2 %294  ;;  %v258_v47 = vmul.f32 %v254_v19, %v237_v29 }
  0x8d   : > { %v256_v32 = vmul.f32 %v254_v19, %v227_v30  ;;  %v304_v34 = vmul.f32 %v297_v20, %v295_v31  ;;  %v975_v30 = vperm.slane %v936_v17, 4 }
  0x8e   : > { %788 = vset.pattern.permute.xlu2 %v829_v14 }
  0x8f   : > { %v306_v33 = vadd.f32 %v299_v28, %v256_v32  ;;  %466 = vperm.xlu1 %786, %v896_v7   ;;  %485 = vperm.xlu2 %788, %v882_v3  }
  0x92   : > { %591 = vperm.xlu0 %794, %v887_v4  }
  0x94   : > { %v252_v36 = vpop.permute.xlu0 %251 }
  0x95   : > { %v271_v37 = vpop.permute.xlu1 %270  ;;  %v261_v38 = vmul.f32 %v254_v19, %v252_v36  ;;  %v322_v39 = vpop.permute.xlu2 %321 }
  0x96   : > { %v298_v40 = vmul.f32 %v297_v20, %v271_v37  ;;  %v343_v48 = vmul.f32 %v340_v43, %v322_v39 }
  0x97   : > { %v951_v41 = vadd.f32 %v304_v34, %v261_v38  ;;  %790 = vset.pattern.permute.xlu1 %v829_v14  ;;  %497 = vperm.xlu2 %788, %v889_v5  }
  0x98   : > { %v305_v42 = vadd.f32 %v298_v40, %v255_v35  ;;  %493 = vperm.xlu1 %790, %v880_v2  }
  0x9d   : > { %v283_v45 = vpop.permute.xlu1 %282  ;;  %v279_v46 = vpop.permute.xlu0 %278 }
  0x9e   : > { %v301_v49 = vmul.f32 %v297_v20, %v283_v45  ;;  %v300_v50 = vmul.f32 %v297_v20, %v279_v46  ;;  %v330_v51 = vpop.permute.xlu2 %329 }
  0x9f   : > { %v345_v52 = vmul.f32 %v340_v43, %v330_v51  ;;  %505 = vperm.xlu2 %788, %v887_v4  }
  0xa0   : > { %v308_v53 = vadd.f32 %v301_v49, %v258_v47  ;;  %v307_v54 = vadd.f32 %v300_v50, %v257_v44  ;;  %501 = vperm.xlu1 %790, %v878_v1  }
  0xa1   : > { %v958_v55 = vadd.f32 %v345_v52, %v309_v26 }
  0xa2   : > { %v350_v56 = vadd.f32 %v343_v48, %v307_v54 }
  0xa5   : > { %v291_v58 = vpop.permute.xlu1 %290 }
  0xa6   : > { %v303_v60 = vmul.f32 %v297_v20, %v291_v58  ;;  %v314_v61 = vpop.permute.xlu0 %313  ;;  %v357_v62 = vpop.permute.xlu2 %356 }
  0xa7   : > { %v341_v63 = vmul.f32 %v340_v43, %v314_v61  ;;  %v384_v0 = vmul.f32 %v383_v57, %v357_v62  ;;  %792 = vset.pattern.permute.xlu2 %v830_v18 }
  0xa8   : > { %v310_v8 = vadd.f32 %v303_v60, %v260_v59  ;;  %791 = vset.pattern.permute.xlu1 %v830_v18  ;;  %532 = vperm.xlu2 %792, %v891_v6   ;;  %v997_v59 = vperm.slane %v936_v17, 5 }
  0xa9   : > { %v348_v9 = vadd.f32 %v341_v63, %v305_v42  ;;  %528 = vperm.xlu1 %791, %v882_v3  }
  0xab   : > { %v966_v10 = vadd.f32 %v384_v0, %v348_v9 }
  0xae   : > { %v318_v11 = vpop.permute.xlu1 %317  ;;  %v334_v12 = vpop.permute.xlu0 %333 }
  0xaf   : > { %v342_v13 = vmul.f32 %v340_v43, %v318_v11  ;;  %v346_v14 = vmul.f32 %v340_v43, %v334_v12  ;;  %v369_v15 = vpop.permute.xlu2 %368 }
  0xb0   : > { %544 = vperm.xlu2 %792, %v878_v1   ;;  %v387_v18 = vmul.f32 %v383_v57, %v369_v15 }
  0xb1   : > { %v349_v16 = vadd.f32 %v342_v13, %v306_v33  ;;  %v353_v19 = vadd.f32 %v346_v14, %v310_v8  ;;  %540 = vperm.xlu1 %791, %v889_v5  }
  0xb6   : > { %v326_v20 = vpop.permute.xlu1 %325 }
  0xb7   : > { %v344_v21 = vmul.f32 %v340_v43, %v326_v20  ;;  %v377_v22 = vpop.permute.xlu2 %376  ;;  %v361_v23 = vpop.permute.xlu0 %360 }
  0xb8   : > { %v389_v24 = vmul.f32 %v383_v57, %v377_v22  ;;  %v385_v3 = vmul.f32 %v383_v57, %v361_v23  ;;  %552 = vperm.xlu2 %792, %v896_v7  }
  0xb9   : > { %v351_v25 = vadd.f32 %v344_v21, %v308_v53  ;;  %548 = vperm.xlu1 %791, %v887_v4  }
  0xba   : > { %v972_v26 = vadd.f32 %v389_v24, %v353_v19  ;;  %v392_v28 = vadd.f32 %v385_v3, %v349_v16 }
  0xbb   : > { %v394_v29 = vadd.f32 %v387_v18, %v351_v25 }
  0xbe   : > { %v338_v31 = vpop.permute.xlu1 %337 }
  0xbf   : > { %v347_v32 = vmul.f32 %v340_v43, %v338_v31  ;;  %v404_v33 = vpop.permute.xlu2 %403  ;;  %v381_v34 = vpop.permute.xlu0 %380 }
  0xc0   : > { %v428_v35 = vmul.f32 %v975_v30, %v404_v33  ;;  %v390_v36 = vmul.f32 %v383_v57, %v381_v34  ;;  %796 = vset.pattern.permute.xlu2 %v831_v27 }
  0xc1   : > { %v354_v37 = vadd.f32 %v347_v32, %v951_v41  ;;  %795 = vset.pattern.permute.xlu1 %v831_v27  ;;  %579 = vperm.xlu2 %796, %v880_v2   ;;  %v1029_v32 = vld [vmem:[%s1106_s1 + $0x8] ss:$0 sm:$0xff] }
  0xc2   : > { %v982_v4 = vadd.f32 %v428_v35, %v392_v28  ;;  %575 = vperm.xlu1 %795, %v891_v6  }
  0xc3   : > { %v397_v38 = vadd.f32 %v390_v36, %v354_v37 }
  0xc7   : > { %v365_v39 = vpop.permute.xlu1 %364  ;;  %v416_v40 = vpop.permute.xlu2 %415 }
  0xc8   : > { %v386_v42 = vmul.f32 %v383_v57, %v365_v39  ;;  %v431_v41 = vmul.f32 %v975_v30, %v416_v40  ;;  %v408_v52 = vpop.permute.xlu0 %407 }
  0xc9   : > { %587 = vperm.xlu2 %796, %v878_v1   ;;  %v429_v16 = vmul.f32 %v975_v30, %v408_v52 }
  0xca   : > { %v393_v43 = vadd.f32 %v386_v42, %v350_v56  ;;  %583 = vperm.xlu1 %795, %v889_v5  }
  0xcc   : > { %v436_v23 = vadd.f32 %v429_v16, %v393_v43 }
  0xcf   : > { %v373_v44 = vpop.permute.xlu1 %372  ;;  %v424_v45 = vpop.permute.xlu2 %423 }
  0xd0   : > { %v388_v27 = vmul.f32 %v383_v57, %v373_v44  ;;  %v433_v2 = vmul.f32 %v975_v30, %v424_v45  ;;  %v1039_v44 = vld [vmem:[%s1107_s2] ss:$0 sm:$0xff] }
  0xd1   : > { %v443_v56 = vpop.permute.xlu0 %442 }
  0xd2   : > { %v395_v46 = vadd.f32 %v388_v27, %v958_v55  ;;  %v990_v47 = vadd.f32 %v433_v2, %v397_v38  ;;  %595 = vperm.xlu1 %795, %v896_v7   ;;  %v1000_v7 = vperm.slane %v936_v17, 6  ;;  %v470_v25 = vmul.f32 %v997_v59, %v443_v56 }
  0xd4   : > { %v438_v6 = vadd.f32 %v431_v41, %v395_v46 }
  0xd8   : > { %v400_v48 = vpop.permute.xlu1 %399  ;;  %v451_v49 = vpop.permute.xlu2 %450 }
  0xd9   : > { %v463_v55 = vpop.permute.xlu0 %462  ;;  %v427_v20 = vmul.f32 %v975_v30, %v400_v48  ;;  %v472_v18 = vmul.f32 %v997_v59, %v451_v49 }
  0xdb   : > { %v434_v3 = vadd.f32 %v427_v20, %v966_v10  ;;  %v479_v28 = vadd.f32 %v472_v18, %v436_v23 }
  0xdd   : > { %v477_v36 = vadd.f32 %v470_v25, %v434_v3 }
  0xe0   : > { %v412_v1 = vpop.permute.xlu1 %411  ;;  %v459_v50 = vpop.permute.xlu2 %458 }
  0xe1   : > { %v430_v5 = vmul.f32 %v975_v30, %v412_v1  ;;  %v474_v10 = vmul.f32 %v997_v59, %v459_v50 }
  0xe2   : > { %v1004_v8 = vpop.permute.xlu0 %489 }
  0xe3   : > { %v437_v51 = vadd.f32 %v430_v5, %v394_v29  ;;  %v1023_v29 = vperm.slane %v936_v17, 7  ;;  %v481_v41 = vadd.f32 %v474_v10, %v438_v6 }
  0xe8   : > { %v420_v53 = vpop.permute.xlu1 %419 }
  0xe9   : > { %v486_v54 = vpop.permute.xlu2 %485  ;;  %v432_v50 = vmul.f32 %v975_v30, %v420_v53 }
  0xea   : > { %v1012_v13 = vpop.permute.xlu0 %509  ;;  %v513_v31 = vmul.f32 %v1000_v7, %v486_v54 }
  0xec   : > { %v520_v37 = vadd.f32 %v513_v31, %v477_v36 }
  0xf1   : > { %v994_v57 = vpop.permute.xlu1 %446  ;;  %v498_v58 = vpop.permute.xlu2 %497 }
  0xf2   : > { %v516_v62 = vmul.f32 %v1000_v7, %v498_v58  ;;  %v471_v16 = vmul.f32 %v997_v59, %v994_v57 }
  0xf3   : > { %v537_v19 = vpop.permute.xlu0 %536 }
  0xf4   : > { %v558_v34 = vmul.f32 %v1023_v29, %v537_v19 }
  0xf9   : > { %v455_v60 = vpop.permute.xlu1 %454  ;;  %v506_v61 = vpop.permute.xlu2 %505 }
  0xfa   : > { %v473_v63 = vmul.f32 %v997_v59, %v455_v60  ;;  %v439_v60 = vadd.f32 %v432_v50, %v972_v26  ;;  %v518_v30 = vmul.f32 %v1000_v7, %v506_v61  ;;  %v478_v61 = vadd.f32 %v471_v16, %v982_v4 }
  0xfc   : > { %v480_v0 = vadd.f32 %v473_v63, %v437_v51  ;;  %v572_v35 = vpop.permute.xlu0 %571 }
  0xfd   : > { %v599_v17 = vmul.f32 %v1029_v32, %v572_v35 }
  0xfe   : > { %v1006_v9 = vadd.f32 %v516_v62, %v480_v0  ;;  %v475_v62 = vmul.f32 %v997_v59, %v463_v55 }
 0x101   : > { %v1008_v11 = vpop.permute.xlu1 %466 }
 0x102   : > { %v1010_v12 = vpop.permute.xlu2 %532  ;;  %v476_v35 = vmul.f32 %v997_v59, %v1008_v11 }
 0x103   : > { %v557_v57 = vmul.f32 %v1023_v29, %v1010_v12 }
 0x104   : > { %v592_v0 = vpop.permute.xlu0 %591 }
 0x105   : > { %v604_v55 = vmul.f32 %v1029_v32, %v592_v0 }
 0x10a   : > { %v494_v14 = vpop.permute.xlu1 %493  ;;  %v545_v15 = vpop.permute.xlu2 %544 }
 0x10b   : > { %v515_v24 = vmul.f32 %v1000_v7, %v494_v14  ;;  %v560_v46 = vmul.f32 %v1023_v29, %v545_v15  ;;  %v482_v14 = vadd.f32 %v475_v62, %v439_v60 }
 0x10d   : > { %v522_v33 = vadd.f32 %v515_v24, %v479_v28  ;;  %v525_v20 = vadd.f32 %v518_v30, %v482_v14 }
 0x10f   : > { %v565_v40 = vadd.f32 %v558_v34, %v522_v33 }
 0x112   : > { %v502_v21 = vpop.permute.xlu1 %501  ;;  %v1017_v22 = vpop.permute.xlu2 %552 }
 0x113   : > { %v517_v42 = vmul.f32 %v1000_v7, %v502_v21  ;;  %v514_v21 = vmul.f32 %v1000_v7, %v1004_v8 }
 0x115   : > { %v524_v48 = vadd.f32 %v517_v42, %v481_v41  ;;  %v521_v3 = vadd.f32 %v514_v21, %v478_v61 }
 0x117   : > { %v567_v56 = vadd.f32 %v560_v46, %v524_v48  ;;  %v564_v31 = vadd.f32 %v557_v57, %v521_v3 }
 0x11b   : > { %v529_v38 = vpop.permute.xlu1 %528  ;;  %v580_v39 = vpop.permute.xlu2 %579 }
 0x11c   : > { %v556_v43 = vmul.f32 %v1023_v29, %v529_v38  ;;  %v601_v45 = vmul.f32 %v1029_v32, %v580_v39  ;;  %v483_v38 = vadd.f32 %v476_v35, %v990_v47  ;;  %v519_v39 = vmul.f32 %v1000_v7, %v1012_v13 }
 0x11e   : > { %v563_v27 = vadd.f32 %v556_v43, %v520_v37  ;;  %v608_v2 = vadd.f32 %v601_v45, %v565_v40  ;;  %v562_v40 = vmul.f32 %v1023_v29, %v1017_v22  ;;  %v526_v11 = vadd.f32 %v519_v39, %v483_v38 }
 0x120   : > { %v619_v49 = vadd.f32 %v1039_v44, %v608_v2  ;;  %v606_v1 = vadd.f32 %v599_v17, %v563_v27 }
 0x122   : > { %v626_v6 = vmax.f32 %v619_v49, 0.0  ;;  %v617_v5 = vadd.f32 %v1039_v44, %v606_v1 }
 0x123   : > { %v541_v51 = vpop.permute.xlu1 %540  ;;  %v588_v52 = vpop.permute.xlu2 %587 }
 0x124   : > { %634 = vst.msk [vmem:[%s1049_s28 + $0x10] sm:$0xff] %vm631_vm0, %v626_v6  ;;  %v624_v54 = vmax.f32 %v617_v5, 0.0  ;;  %v603_v58 = vmul.f32 %v1029_v32, %v588_v52  ;;  %v559_v4 = vmul.f32 %v1023_v29, %v541_v51 }
 0x126   : > { %632 = vst.msk [vmem:[%s1049_s28] sm:$0xff] %vm631_vm0, %v624_v54  ;;  %v610_v63 = vadd.f32 %v603_v58, %v567_v56  ;;  %v566_v10 = vadd.f32 %v559_v4, %v1006_v9  ;;  %v569_v9 = vadd.f32 %v562_v40, %v526_v11 }
 0x128   : > { %v621_v53 = vadd.f32 %v1039_v44, %v610_v63 }
 0x12a   : > { %v628_v15 = vmax.f32 %v621_v53, 0.0 }
 0x12b   : > { %v549_v19 = vpop.permute.xlu1 %548 }
 0x12c   : > { %636 = vst.msk [vmem:[%s1049_s28 + $0x20] sm:$0xff] %vm631_vm0, %v628_v15  ;;  %v561_v26 = vmul.f32 %v1023_v29, %v549_v19 }
 0x12e   : > { %v568_v18 = vadd.f32 %v561_v26, %v525_v20 }
 0x130   : > { %v611_v23 = vadd.f32 %v604_v55, %v568_v18 }
 0x132   : > { %v622_v24 = vadd.f32 %v1039_v44, %v611_v23 }
 0x134   : > { %v629_v25 = vmax.f32 %v622_v24, 0.0  ;;  %v576_v28 = vpop.permute.xlu1 %575 }
 0x135   : > { %v600_v33 = vmul.f32 %v1029_v32, %v576_v28 }
 0x136   : > { %637 = vst.msk [vmem:[%s1049_s28 + $0x28] sm:$0xff] %vm631_vm0, %v629_v25 }
 0x137   : > { %v607_v34 = vadd.f32 %v600_v33, %v564_v31 }
 0x139   : > { %v618_v8 = vadd.f32 %v1039_v44, %v607_v34 }
 0x13b   : > { %v625_v12 = vmax.f32 %v618_v8, 0.0 }
 0x13c   : > { %v584_v36 = vpop.permute.xlu1 %583 }
 0x13d   : > { %633 = vst.msk [vmem:[%s1049_s28 + $0x8] sm:$0xff] %vm631_vm0, %v625_v12  ;;  %v602_v37 = vmul.f32 %v1029_v32, %v584_v36 }
 0x13f   : > { %v609_v17 = vadd.f32 %v602_v37, %v566_v10 }
 0x141   : > { %v620_v59 = vadd.f32 %v1039_v44, %v609_v17 }
 0x143   : > { %v627_v42 = vmax.f32 %v620_v59, 0.0 }
 0x144   : > { %v596_v43 = vpop.permute.xlu1 %595 }
 0x145   : > { %635 = vst.msk [vmem:[%s1049_s28 + $0x18] sm:$0xff] %vm631_vm0, %v627_v42  ;;  %v605_v45 = vmul.f32 %v1029_v32, %v596_v43 }
 0x147   : > { %v612_v41 = vadd.f32 %v605_v45, %v569_v9 }
 0x149   : > { %v623_v47 = vadd.f32 %v1039_v44, %v612_v41 }
 0x14b   : > { %v630_v27 = vmax.f32 %v623_v47, 0.0 }
 0x14d   : > { %639 = vst.msk [vmem:[%s1049_s28 + $0x30] sm:$0x1] %vm638_vm1, %v630_v27 }
 0x14e PF: > { %s13_s14 = sadd.s32 1, %s821_s14   ;;  %s1109_s12 = smov %s817_s13 }
 0x14f   : > { %p10_p5 = scmp.ge.s32.totalorder %s13_s14, 4   ;;  %s1110_s13 = smov %s1112_s15 }
 0x151   :  { %12 = sbr.rel (!%p10_p5) target bundleno = 2 (0x2), region = 62 }

// kernel: conv2d_subsampling4_forward.3
= control target key start
LH: loop header
LB: loop body
LE: loop exit
PB: predicated region body
PF: predicated region fallthrough
CT: control target
= control target key end

     0   :  { %s1582_s24 = smov 0   ;;  %s1584_s25 = smov 0   ;;  %s1918_s0 = inlined_call_operand.vmem [shape: f32[2,7,7,32], index: 0, kind: input, shape index: {}, may-alias: {0,1}]   ;;  %s1919_s1 = inlined_call_operand.vmem [shape: f32[2,7,7,32], index: 1, kind: input, shape index: {}, may-alias: {0,1}]   ;;  %s1920_s2 = inlined_call_operand.vmem [shape: f32[3,32], index: 2, kind: input, shape index: {}]   ;;  %s1921_s3 = inlined_call_operand.vmem [shape: bf16[9,32,32], index: 3, kind: input, shape index: {}]   ;;  %s1922_s4 = inlined_call_operand.vmem [shape: bf16[3,32,32], index: 4, kind: input, shape index: {}]   ;;  %s1923_s5 = inlined_call_operand.vmem [shape: f32[1,32], index: 5, kind: input, shape index: {}]   ;;  %s1924_s6 = inlined_call_operand.vmem [shape: f32[1,32], index: 6, kind: input, shape index: {}]   ;;  %s1925_s7 = inlined_call_operand.vmem [shape: f32[2,3,32], index: 7, kind: output, shape index: {}]  }
   0x1   :  { %s1586_s26 = smov 0  }
   0x2 LB: > { %s29_s27 = sadd.s32 1, %s1536_s25  ;;  %p1274_p0 = scmp.ge.s32.totalorder %s1540_s26, 1  ;;  %s1540_s26 = sphi %s1586_s26, %s17_s26   ;;  %s1536_s25 = sphi %s1584_s25, %s1927_s25   ;;  %s1532_s24 = sphi %s1582_s24, %s1926_s24  }
   0x3   : > { %p31_p1 = scmp.ge.s32.totalorder %s29_s27, 2  ;;  %p306_p2 = scmp.lt.s32.totalorder %s1540_s26, 3 }
   0x5   : > { %s1929_s27 = smov (%p31_p1, %s29_s27), 0  ;;  %p307_p3 = pnand %p1274_p0, %p306_p2 }
   0x6   : > { %p369_p4 = scmp.lt.s32.totalorder (!%p307_p3), %s1532_s24, 1 }
   0x7   : > { %310 = sbr.rel (%p307_p3) target bundleno = 352 (0x160), region = 48 }
   0xc   : > { %v1468_v0 = vld [vmem:[%s1921_s3 + $0x18] sm:$0xff]  ;;  %v1466_v1 = vld [vmem:[%s1921_s3 + $0x8] sm:$0xff]  ;;  %v1467_v4 = vld [vmem:[%s1921_s3 + $0x10] sm:$0xff]  ;;  %s1931_s24 = smov (!%p369_p4, %s1532_s24), 1  ;;  %vm442_vm0 = vcmask 1040384   ;;  %vm444_vm1 = vcmask 1041408  }
   0xd   : > { %v1470_v2 = vld [vmem:[%s1921_s3 + $0x28] sm:$0xff]  ;;  %v1472_v3 = vld [vmem:[%s1921_s3 + $0x38] sm:$0xff]  ;;  %526 = vmatpush.bf16.msra.mxu0 %v1468_v0  ;;  %555 = vmatpush.bf16.msra.mxu1 %v1466_v1  ;;  %v1465_v5 = vld [vmem:[%s1921_s3] sm:$0xff]  ;;  %s1489_s21 = smul.u32 56, %s1931_s24  ;;  %vm446_vm2 = vcmask 1042432   ;;  %vm448_vm3 = vcmask 1043456  }
   0xe   : > { %617 = vmatpush.bf16.msra.mxu2 %v1470_v2  ;;  %694 = vmatpush.bf16.msra.mxu3 %v1472_v3  ;;  %v1469_v6 = vld [vmem:[%s1921_s3 + $0x20] sm:$0xff]  ;;  %v1471_v7 = vld [vmem:[%s1921_s3 + $0x30] sm:$0xff]  ;;  %v1474_v8 = vld [vmem:[%s1921_s3 + $0x48] sm:$0xff]  ;;  %vm450_vm4 = vcmask 1044480   ;;  %vm452_vm5 = vcmask 1045504   ;;  %vm454_vm6 = vcmask 1046528  }
   0xf   : > { %v1478_v9 = vld [vmem:[%s1921_s3 + $0x68] sm:$0xff]  ;;  %v1480_v10 = vld [vmem:[%s1921_s3 + $0x78] sm:$0xff]  ;;  %s1644_s13 = scalar_lea.vmem %s1918_s0, %s1489_s21  ;;  %v1473_v12 = vld [vmem:[%s1921_s3 + $0x40] sm:$0xff]  ;;  %vm516_vm7 = vcmask 261120   ;;  %s1464_s8 = sadd.s32 48, %s1489_s21  ;;  %vm1156_vm8 = vcmask 256000  }
  0x10   : > { %v1476_v11 = vld [vmem:[%s1921_s3 + $0x58] sm:$0xff]  ;;  %v1477_v13 = vld [vmem:[%s1921_s3 + $0x60] sm:$0xff]  ;;  %v1653_v14 = vld [vmem:[%s1644_s13 + $0x11] sm:$0x1]  ;;  %s1782_s10 = scalar_lea.vmem %s1919_s1, %s1464_s8  ;;  %s1277_s21 = sshll.u32 %s1931_s24, 2 }
  0x11   : > { %527 = vmatpush.bf16.msra.mxu0 %v1467_v4  ;;  %556 = vmatpush.bf16.msra.mxu1 %v1465_v5  ;;  %v1656_v15 = vld [vmem:[%s1644_s13 + $0x21] sm:$0x1]  ;;  %v1479_v16 = vld [vmem:[%s1921_s3 + $0x70] sm:$0xff]  ;;  %v464_v19 = vld [vmem:[%s1644_s13 + $0x3] sm:$0x1]  ;;  %v471_v24 = vrot.slane %v1653_v14, 7 }
  0x12   : > { %618 = vmatpush.bf16.msra.mxu2 %v1469_v6  ;;  %695 = vmatpush.bf16.msra.mxu3 %v1471_v7  ;;  %v1475_v17 = vld [vmem:[%s1921_s3 + $0x50] sm:$0xff]  ;;  %v461_v18 = vld [vmem:[%s1644_s13 + $0x1] sm:$0x1]  ;;  %v1670_v21 = vld [vmem:[%s1644_s13 + $0x23] sm:$0x1]  ;;  %v474_v25 = vrot.slane %v1656_v15, 6 }
  0x13   : > { %v1667_v20 = vld [vmem:[%s1644_s13 + $0x13] sm:$0x1]  ;;  %v467_v22 = vld [vmem:[%s1644_s13 + $0x5] sm:$0x1]  ;;  %v1674_v23 = vld [vmem:[%s1644_s13 + $0x15] sm:$0x1]  ;;  %v491_v32 = vsel %vm442_vm0, %v461_v18, %v471_v24 }
  0x14   : > { %v477_v26 = vrot.slane %v464_v19, 5  ;;  %v480_v27 = vrot.slane %v1667_v20, 4  ;;  %v1680_v28 = vld [vmem:[%s1644_s13 + $0x10] sm:$0x1]  ;;  %v483_v29 = vrot.slane %v1670_v21, 3  ;;  %v486_v30 = vrot.slane %v467_v22, 2 }
  0x15   : > { %768 = vmatpush.bf16.msrb.mxu0 %v1474_v8  ;;  %832 = vmatpush.bf16.msrb.mxu1 %v1476_v11  ;;  %v489_v31 = vrot.slane %v1674_v23, 1  ;;  %v410_v33 = vld [vmem:[%s1644_s13] sm:$0x1]  ;;  %v1690_v35 = vld [vmem:[%s1644_s13 + $0x25] sm:$0x1]  ;;  %v492_v36 = vsel %vm444_vm1, %v491_v32, %v474_v25  ;;  %v908_v37 = vrot.slane %v1656_v15, 7 }
  0x16   : > { %895 = vmatpush.bf16.msrb.mxu2 %v1478_v9  ;;  %959 = vmatpush.bf16.msrb.mxu3 %v1480_v10  ;;  %v1687_v34 = vld [vmem:[%s1644_s13 + $0x20] sm:$0x1]  ;;  %v913_v38 = vrot.slane %v1667_v20, 5  ;;  %v415_v39 = vld [vmem:[%s1644_s13 + $0x2] sm:$0x1]  ;;  %v422_v40 = vrot.slane %v1680_v28, 7  ;;  %v493_v41 = vsel %vm446_vm2, %v492_v36, %v477_v26 }
  0x17   : > { %v915_v42 = vrot.slane %v1670_v21, 4  ;;  %v920_v43 = vrot.slane %v1674_v23, 2  ;;  %v1701_v44 = vld [vmem:[%s1644_s13 + $0x12] sm:$0x1]  ;;  %v1704_v45 = vld [vmem:[%s1644_s13 + $0x22] sm:$0x1]  ;;  %v494_v46 = vsel %vm448_vm3, %v493_v41, %v480_v27  ;;  %v1754_v27 = vsel %vm442_vm0, %v1653_v14, %v908_v37 }
  0x18   : > { %v418_v47 = vld [vmem:[%s1644_s13 + $0x4] sm:$0x1]  ;;  %v425_v49 = vrot.slane %v1687_v34, 6  ;;  %v428_v50 = vrot.slane %v415_v39, 5  ;;  %v495_v51 = vsel %vm450_vm4, %v494_v46, %v483_v29  ;;  %v923_v52 = vrot.slane %v1690_v35, 1 }
  0x19   : > { %769 = vmatpush.bf16.msrb.mxu0 %v1473_v12  ;;  %833 = vmatpush.bf16.msrb.mxu1 %v1475_v17  ;;  %v1709_v48 = vld [vmem:[%s1644_s13 + $0x24] sm:$0x1]  ;;  %v1715_v53 = vld [vmem:[%s1644_s13 + $0x14] sm:$0x1]  ;;  %v431_v54 = vrot.slane %v1701_v44, 4  ;;  %v434_v55 = vrot.slane %v1704_v45, 3  ;;  %v496_v56 = vsel %vm452_vm5, %v495_v51, %v486_v30  ;;  %v443_v59 = vsel %vm442_vm0, %v410_v33, %v422_v40 }
  0x1a   : > { %896 = vmatpush.bf16.msrb.mxu2 %v1477_v13  ;;  %960 = vmatpush.bf16.msrb.mxu3 %v1479_v16  ;;  %v437_v57 = vrot.slane %v418_v47, 2  ;;  %v440_v58 = vrot.slane %v1715_v53, 1  ;;  %v497_v60 = vsel %vm454_vm6, %v496_v56, %v489_v31  ;;  %v445_v61 = vsel %vm444_vm1, %v443_v59, %v425_v49  ;;  %v563_v0 = vld [vmem:[%s1644_s13 + $0x6] sm:$0x1]  ;;  %v1731_v5 = vld [vmem:[%s1644_s13 + $0x16] sm:$0x1] }
  0x1b   : > { %v570_v62 = vrot.slane %v418_v47, 5  ;;  %v575_v63 = vrot.slane %v1709_v48, 3  ;;  %v498_v1 = vpack.c.bf16 %v1690_v35, %v497_v60  ;;  %v447_v2 = vsel %vm446_vm2, %v445_v61, %v428_v50  ;;  %v1328_v6 = vld [vmem:[%s1644_s13 + $0x18] sm:$0x1]  ;;  %v1329_v11 = vld [vmem:[%s1644_s13 + $0x28] sm:$0x1] }
  0x1c   : > { %v845_v3 = vrot.slane %v1687_v34, 7  ;;  %v859_v4 = vrot.slane %v1709_v48, 1  ;;  %v449_v7 = vsel %vm448_vm3, %v447_v2, %v431_v54  ;;  %v970_v8 = vrot.slane %v1704_v45, 7  ;;  %v1482_v12 = vld [vmem:[%s1921_s3 + $0x88] sm:$0xff]  ;;  %v1331_v18 = vld [vmem:[%s1644_s13 + $0x1a] sm:$0x1] }
  0x1d   : > { %v566_v9 = vrot.slane %v1701_v44, 7  ;;  %v568_v10 = vrot.slane %v1704_v45, 6  ;;  %1302 = vmatmul.msk.bf16.vlgmr.msra.gmra.mxu0 %vm516_vm7, %v498_v1  ;;  %v451_v13 = vsel %vm450_vm4, %v449_v7, %v434_v55  ;;  %v974_v15 = vrot.slane %v1715_v53, 5  ;;  %v1330_v17 = vld [vmem:[%s1644_s13 + $0xa] sm:$0x1]  ;;  %v1481_v29 = vld [vmem:[%s1921_s3 + $0x80] sm:$0xff] }
  0x1e   : > { %v572_v16 = vrot.slane %v1715_v53, 4  ;;  %v453_v19 = vsel %vm452_vm5, %v451_v13, %v437_v57  ;;  %v578_v22 = vrot.slane %v563_v0, 2  ;;  %v1332_v25 = vld [vmem:[%s1644_s13 + $0x2a] sm:$0x1]  ;;  %v1333_v26 = vld [vmem:[%s1644_s13 + $0xc] sm:$0x1]  ;;  %1020 = vmatpush.bf16.msra.mxu0 %v1482_v12 }
  0x1f   : > { %v583_v24 = vsel %vm442_vm0, %v415_v39, %v566_v9  ;;  %v455_v30 = vsel %vm454_vm6, %v453_v19, %v440_v58  ;;  %v1327_v32 = vld [vmem:[%s1644_s13 + $0x8] sm:$0x1]  ;;  %v640_v33 = vrot.slane %v1328_v6, 7  ;;  %v643_v36 = vrot.slane %v1329_v11, 6  ;;  %v1334_v46 = vld [vmem:[%s1644_s13 + $0x1c] sm:$0x1] }
  0x20   : > { %v584_v31 = vsel %vm444_vm1, %v583_v24, %v568_v10  ;;  %v456_v39 = vpack.c.bf16 %v1709_v48, %v455_v30  ;;  %v581_v40 = vrot.slane %v1731_v5, 1  ;;  %v646_v37 = vrot.slane %v1330_v17, 5  ;;  %v1771_v51 = vld [vmem:[%s1644_s13 + $0x26] sm:$0x1]  ;;  %v1350_v58 = vld [vmem:[%s1644_s13 + $0x19] sm:$0x1] }
  0x21   : > { %v585_v14 = vsel %vm446_vm2, %v584_v31, %v570_v62  ;;  %v649_v47 = vrot.slane %v1331_v18, 4  ;;  %v652_v49 = vrot.slane %v1332_v25, 3  ;;  %v655_v50 = vrot.slane %v1333_v26, 2  ;;  %v1351_v0 = vld [vmem:[%s1644_s13 + $0x29] sm:$0x1] }
  0x22   : > { %v586_v41 = vsel %vm448_vm3, %v585_v14, %v572_v16  ;;  %1311 = vmatmul.msk.bf16.vlgmr.msra.gmra.mxu1 %vm516_vm7, %v456_v39  ;;  %v660_v55 = vsel %vm442_vm0, %v1327_v32, %v640_v33  ;;  %v781_v56 = vrot.slane %v1331_v18, 7  ;;  %v783_v57 = vrot.slane %v1332_v25, 6  ;;  %1021 = vmatpush.bf16.msra.mxu0 %v1481_v29  ;;  %v1335_v1 = vld [vmem:[%s1644_s13 + $0x2c] sm:$0x1]  ;;  %v1352_v9 = vld [vmem:[%s1644_s13 + $0xb] sm:$0x1] }
  0x23   : > { %v587_v54 = vsel %vm450_vm4, %v586_v41, %v575_v63  ;;  %v661_v60 = vsel %vm444_vm1, %v660_v55, %v643_v36  ;;  %v785_v61 = vrot.slane %v1333_v26, 5  ;;  %v787_v62 = vrot.slane %v1334_v46, 4  ;;  %v1353_v10 = vld [vmem:[%s1644_s13 + $0x1b] sm:$0x1]  ;;  %v1354_v16 = vld [vmem:[%s1644_s13 + $0x2b] sm:$0x1] }
  0x24   : > { %v588_v59 = vsel %vm452_vm5, %v587_v54, %v578_v22  ;;  %v658_v2 = vrot.slane %v1334_v46, 1  ;;  %v662_v6 = vsel %vm446_vm2, %v661_v60, %v646_v37  ;;  %v798_v7 = vsel %vm442_vm0, %v1330_v17, %v781_v56  ;;  %v1355_v18 = vld [vmem:[%s1644_s13 + $0xd] sm:$0x1]  ;;  %v1349_v17 = vld [vmem:[%s1644_s13 + $0x9] sm:$0x1] }
  0x25   : > { %v589_v63 = vsel %vm454_vm6, %v588_v59, %v581_v40  ;;  %v663_v12 = vsel %vm448_vm3, %v662_v6, %v649_v47  ;;  %v799_v13 = vsel %vm444_vm1, %v798_v7, %v783_v57  ;;  %v714_v19 = vrot.slane %v1350_v58, 7  ;;  %v842_v29 = vld [vmem:[%s1782_s10] sm:$0x1]  ;;  %v1356_v33 = vld [vmem:[%s1644_s13 + $0x1d] sm:$0x1] }
  0x26   : > { %v590_v11 = vpack.c.bf16 %v1771_v51, %v589_v63  ;;  %v976_v22 = vrot.slane %v1709_v48, 4  ;;  %v664_v24 = vsel %vm450_vm4, %v663_v12, %v652_v49  ;;  %v800_v25 = vsel %vm446_vm2, %v799_v13, %v785_v61  ;;  %v843_v39 = vld [vmem:[%s1782_s10 + $0x2] sm:$0x1]  ;;  %v906_v59 = vld [vmem:[%s1782_s10 + $0x3] sm:$0x1] }
  0x27   : > { %v717_v26 = vrot.slane %v1351_v0, 6  ;;  %v665_v30 = vsel %vm452_vm5, %v664_v24, %v655_v50  ;;  %v790_v31 = vrot.slane %v1335_v1, 3  ;;  %v801_v32 = vsel %vm448_vm3, %v800_v25, %v787_v62  ;;  %v905_v50 = vld [vmem:[%s1782_s10 + $0x1] sm:$0x1]  ;;  %v1357_v7 = vld [vmem:[%s1644_s13 + $0x2d] sm:$0x1] }
  0x28   : > { %1326 = vmatmul.msk.bf16.vlgmr.msra.gmra.mxu2 %vm516_vm7, %v590_v11  ;;  %v720_v36 = vrot.slane %v1352_v9, 5  ;;  %v666_v40 = vsel %vm454_vm6, %v665_v30, %v658_v2  ;;  %v723_v14 = vrot.slane %v1353_v10, 4  ;;  %v726_v37 = vrot.slane %v1354_v16, 3  ;;  %v1371_v13 = vld [vmem:[%s1644_s13 + $0xe] sm:$0x1] }
  0x29   : > { %v729_v41 = vrot.slane %v1355_v18, 2  ;;  %v667_v46 = vpack.c.bf16 %v1335_v1, %v666_v40  ;;  %v734_v47 = vsel %vm442_vm0, %v1349_v17, %v714_v19  ;;  %v848_v49 = vrot.slane %v842_v29, 6  ;;  %v844_v16 = vld [vmem:[%s1782_s10 + $0x4] sm:$0x1]  ;;  %v1373_v21 = vld [vmem:[%s1644_s13 + $0x2e] sm:$0x1] }
  0x2a   : > { %v850_v54 = vrot.slane %v1701_v44, 5  ;;  %v732_v55 = vrot.slane %v1356_v33, 1  ;;  %v735_v56 = vsel %vm444_vm1, %v734_v47, %v717_v26  ;;  %v852_v57 = vrot.slane %v1704_v45, 4  ;;  %v1483_v47 = vld [vmem:[%s1922_s4] sm:$0xff] }
  0x2b   : > { %v855_v58 = vrot.slane %v843_v39, 3  ;;  %1348 = vmatmul.msk.bf16.vlgmr.msra.gmra.mxu3 %vm516_vm7, %v667_v46  ;;  %v736_v60 = vsel %vm446_vm2, %v735_v56, %v720_v36  ;;  %v857_v61 = vrot.slane %v1715_v53, 2  ;;  %v861_v62 = vsel %vm442_vm0, %v1680_v28, %v845_v3  ;;  %v1488_v46 = vld [vmem:[%s1922_s4 + $0x28] sm:$0xff] }
  0x2c   : > { %v972_v0 = vrot.slane %v843_v39, 6  ;;  %v737_v63 = vsel %vm448_vm3, %v736_v60, %v723_v14  ;;  %v862_v1 = vsel %vm444_vm1, %v861_v62, %v848_v49  ;;  %v986_v2 = vsel %vm442_vm0, %v1701_v44, %v970_v8  ;;  %v1372_v44 = vld [vmem:[%s1644_s13 + $0x1e] sm:$0x1]  ;;  %1140 = vmatpush.bf16.msra.mxu3 %v1488_v46  ;;  %s408_s13 = scalar_lea.vmem %s1925_s7, %s1277_s21 }
  0x2d   : > { %v911_v6 = vrot.slane %v905_v50, 6  ;;  %v738_v34 = vsel %vm450_vm4, %v737_v63, %v726_v37  ;;  %v863_v9 = vsel %vm446_vm2, %v862_v1, %v850_v54  ;;  %v918_v3 = vrot.slane %v906_v59, 3  ;;  %v1486_v49 = vld [vmem:[%s1922_s4 + $0x18] sm:$0xff]  ;;  %v1485_v59 = vld [vmem:[%s1922_s4 + $0x10] sm:$0xff] }
  0x2e   : > { %v987_v28 = vsel %vm444_vm1, %v986_v2, %v972_v0  ;;  %v802_v10 = vsel %vm450_vm4, %v801_v32, %v790_v31  ;;  %v739_v11 = vsel %vm452_vm5, %v738_v34, %v729_v41  ;;  %v864_v12 = vsel %vm448_vm3, %v863_v9, %v852_v57  ;;  %1077 = vmatpush.bf16.msra.mxu1 %v1486_v49 }
  0x2f   : > { %v926_v45 = vsel %vm444_vm1, %v1754_v27, %v911_v6  ;;  %v740_v8 = vsel %vm454_vm6, %v739_v11, %v732_v55  ;;  %v865_v18 = vsel %vm450_vm4, %v864_v12, %v855_v58  ;;  %v988_v19 = vsel %vm446_vm2, %v987_v28, %v974_v15  ;;  %v1487_v58 = vld [vmem:[%s1922_s4 + $0x20] sm:$0xff] }
  0x30   : > { %v927_v24 = vsel %vm446_vm2, %v926_v45, %v913_v38  ;;  %v741_v25 = vpack.c.bf16 %v1357_v7, %v740_v8  ;;  %v866_v27 = vsel %vm452_vm5, %v865_v18, %v857_v61  ;;  %v979_v17 = vrot.slane %v844_v16, 3  ;;  %1141 = vmatpush.bf16.msra.mxu3 %v1487_v58 }
  0x31   : > { %v928_v26 = vsel %vm448_vm3, %v927_v24, %v915_v42  ;;  %v867_v29 = vsel %vm454_vm6, %v866_v27, %v859_v4  ;;  %v793_v15 = vrot.slane %v1371_v13, 2  ;;  %v796_v30 = vrot.slane %v1372_v44, 1  ;;  %v907_v4 = vld [vmem:[%s1782_s10 + $0x5] sm:$0x1]  ;;  %v1516_v13 = vld [vmem:[%s1923_s5] ss:$0 sm:$0xff] }
  0x32   : > { %v929_v53 = vsel %vm450_vm4, %v928_v26, %v918_v3  ;;  %1370 = vmatmul.msk.bf16.vlgmr.msrb.gmra.mxu0 %vm516_vm7, %v741_v25  ;;  %v989_v20 = vsel %vm448_vm3, %v988_v19, %v976_v22  ;;  %v868_v31 = vpack.c.bf16 %v844_v16, %v867_v29  ;;  %v981_v48 = vrot.slane %v1731_v5, 2  ;;  %v969_v5 = vld [vmem:[%s1782_s10 + $0x6] sm:$0x1]  ;;  %1078 = vmatpush.bf16.msra.mxu1 %v1485_v59 }
  0x33   : > { %v930_v38 = vsel %vm452_vm5, %v929_v53, %v920_v43  ;;  %v803_v42 = vsel %vm452_vm5, %v802_v10, %v793_v15  ;;  %v990_v22 = vsel %vm450_vm4, %v989_v20, %v979_v17  ;;  %v984_v23 = vrot.slane %v1771_v51, 1  ;;  %v1484_v51 = vld [vmem:[%s1922_s4 + $0x8] sm:$0xff] }
  0x34   : > { %v931_v32 = vsel %vm454_vm6, %v930_v38, %v923_v52  ;;  %v804_v33 = vsel %vm454_vm6, %v803_v42, %v796_v30  ;;  %v991_v39 = vsel %vm452_vm5, %v990_v22, %v981_v48  ;;  %1104 = vmatpush.bf16.msra.mxu2 %v1484_v51 }
  0x35   : > { %v805_v36 = vpack.c.bf16 %v1373_v21, %v804_v33  ;;  %v932_v43 = vpack.c.bf16 %v907_v4, %v931_v32  ;;  %v992_v35 = vsel %vm454_vm6, %v991_v39, %v984_v23  ;;  %v1517_v23 = vld [vmem:[%s1924_s6] ss:$0 sm:$0xff] }
  0x36   : > { %v993_v52 = vpack.c.bf16 %v969_v5, %v992_v35  ;;  %v1154_v35 = vld [vmem:[%s1920_s2] sm:$0x7] }
  0x37   : > { %1386 = vmatmul.msk.bf16.vlgmr.msrb.gmra.mxu1 %vm516_vm7, %v805_v36 }
  0x38   : > { %1399 = vmatmul.msk.bf16.vlgmr.msrb.gmra.mxu2 %vm516_vm7, %v868_v31 }
  0x39   : > { %1105 = vmatpush.bf16.msra.mxu2 %v1483_v47 }
  0x3b   : > { %1412 = vmatmul.msk.bf16.vlgmr.msrb.gmra.mxu3 %vm516_vm7, %v932_v43 }
  0x42   : > { %1425 = vmatmul.msk.bf16.vlgmr.msra.gmra.mxu0 %vm516_vm7, %v993_v52 }
  0x9a   : > { %v529_v40 = vpop.f32.mrf.mxu0 }
  0x9f   : > { %v558_v14 = vpop.f32.mrf.mxu1 }
  0xa0   : > { %v559_v50 = vadd.f32 %v558_v14, %v529_v40 }
  0xa2   : > { %v531_v37 = vpop.f32.mrf.mxu0 }
  0xa7   : > { %v560_v54 = vpop.f32.mrf.mxu1 }
  0xa8   : > { %v561_v0 = vadd.f32 %v560_v54, %v531_v37 }
  0xab   : > { %v620_v41 = vpop.f32.mrf.mxu2 }
  0xac   : > { %v625_v56 = vadd.f32 %v620_v41, %v559_v50 }
  0xae   : > { %v697_v55 = vpop.f32.mrf.mxu3 }
  0xaf   : > { %v771_v57 = vpop.f32.mrf.mxu0  ;;  %v702_v61 = vadd.f32 %v697_v55, %v625_v56 }
  0xb1   : > { %v776_v63 = vadd.f32 %v771_v57, %v702_v61 }
  0xb3   : > { %v622_v60 = vpop.f32.mrf.mxu2 }
  0xb4   : > { %v835_v62 = vpop.f32.mrf.mxu1  ;;  %v626_v2 = vadd.f32 %v622_v60, %v561_v0 }
  0xb5   : > { %v840_v7 = vadd.f32 %v835_v62, %v776_v63 }
  0xb6   : > { %v699_v1 = vpop.f32.mrf.mxu3 }
  0xb7   : > { %v773_v6 = vpop.f32.mrf.mxu0  ;;  %v703_v9 = vadd.f32 %v699_v1, %v626_v2 }
  0xb9   : > { %v777_v3 = vadd.f32 %v773_v6, %v703_v9 }
  0xbb   : > { %v898_v34 = vpop.f32.mrf.mxu2 }
  0xbc   : > { %v903_v28 = vadd.f32 %v898_v34, %v840_v7  ;;  %v837_v11 = vpop.f32.mrf.mxu1 }
  0xbd   : > { %v841_v44 = vadd.f32 %v837_v11, %v777_v3 }
  0xbe   : > { %v962_v10 = vpop.f32.mrf.mxu3 }
  0xbf   : > { %v967_v12 = vadd.f32 %v962_v10, %v903_v28  ;;  %v1023_v45 = vpop.f32.mrf.mxu0 }
  0xc1   : > { %v1028_v8 = vadd.f32 %v1023_v45, %v967_v12 }
  0xc3   : > { %v900_v16 = vpop.f32.mrf.mxu2  ;;  %v1034_v19 = vadd.f32 %v1516_v13, %v1028_v8 }
  0xc4   : > { %v904_v18 = vadd.f32 %v900_v16, %v841_v44 }
  0xc5   : > { %v1036_v24 = vmax.f32 %v1034_v19, 0.0 }
  0xc6   : > { %v964_v25 = vpop.f32.mrf.mxu3 }
  0xc7   : > { %v968_v27 = vadd.f32 %v964_v25, %v904_v18  ;;  %v1038_v17 = vpack.c.bf16 %v1036_v24, %v1036_v24  ;;  %v1025_v26 = vpop.f32.mrf.mxu0 }
  0xc9   : > { %v1049_v29 = vshrl.u32 %v1038_v17, 16  ;;  %v1052_v53 = vshll.u32 %v1038_v17, 16  ;;  %v1029_v15 = vadd.f32 %v1025_v26, %v968_v27  ;;  %1447 = vmatmul.msk.bf16.vlgmr.msra.gmra.mxu2 %vm516_vm7, %v1038_v17 }
  0xcb   : > { %v1051_v30 = vrot.slane %v1049_v29, 1  ;;  %v1054_v20 = vrot.slane %v1052_v53, 2  ;;  %v1035_v38 = vadd.f32 %v1516_v13, %v1029_v15 }
  0xcd   : > { %v1037_v21 = vmax.f32 %v1035_v38, 0.0  ;;  %v1055_v31 = vor.u32 %v1054_v20, %v1051_v30 }
  0xcf   : > { %v1111_v42 = vpack.c.bf16 %v1037_v21, %v1036_v24  ;;  %1438 = vmatmul.msk.bf16.vlgmr.msra.gmra.mxu1 %vm516_vm7, %v1055_v31 }
  0xd1   : > { %v1118_v48 = vrot.slane %v1111_v42, 3 }
  0xd3   : > { %1460 = vmatmul.msk.bf16.vlgmr.msra.gmra.mxu3 %vm516_vm7, %v1118_v48 }
 0x14c   : > { %v1080_v4 = vpop.f32.mrf.mxu1  ;;  %v1107_v32 = vpop.f32.mrf.mxu2 }
 0x14d   : > { %v1108_v36 = vadd.f32 %v1107_v32, %v1080_v4 }
 0x154   : > { %v1082_v33 = vpop.f32.mrf.mxu1  ;;  %v1109_v22 = vpop.f32.mrf.mxu2 }
 0x156   : > { %v1143_v43 = vpop.f32.mrf.mxu3 }
 0x157   : > { %v1147_v39 = vadd.f32 %v1143_v43, %v1108_v36 }
 0x159   : > { %v1152_v5 = vadd.f32 %v1517_v23, %v1147_v39 }
 0x15b   : > { %v1153_v52 = vmul.f32 5.656854, %v1152_v5 }
 0x15d   : > { %v1155_v40 = vadd.f32 %v1154_v35, %v1153_v52 }
 0x15e   : > { %v1145_v14 = vpop.f32.mrf.mxu3 }
 0x15f   : > { %1157 = vst.msk [vmem:[%s408_s13] sm:$0x7] %vm1156_vm8, %v1155_v40 }
 0x160 PF: > { %s17_s26 = sadd.s32 1, %s1540_s26   ;;  %s1926_s24 = smov %s1536_s25 }
 0x161   : > { %p14_p5 = scmp.ge.s32.totalorder %s17_s26, 4   ;;  %s1927_s25 = smov %s1929_s27 }
 0x163   :  { %16 = sbr.rel (!%p14_p5) target bundleno = 2 (0x2), region = 99 }

</bundles_post_ra>
